<compile_context>
chip_gen: v5e
topology: v5e:2x2
jax: 0.10.0
libtpu: 0.0.40
codegen_flags: <defaults>
</compile_context>

<pallas_src>
import functools
import math

import jax
import jax.numpy as jnp
from jax.experimental import pallas as pl
from jax.experimental.pallas import tpu as pltpu


def _eca_kernel(x_ref, w_ref, o_ref, acc_ref, attn_ref, *stash,
                k_size, inv_hw, use_stash):
    """Processes one (C, T) spatial tile of one batch element.

    x_ref:    (C, T)   input tile                         (VMEM)
    w_ref:    (k,)     Conv1d taps                        (SMEM scalars)
    o_ref:    (C, T)   output tile                        (VMEM)
    acc_ref:  (C, 128) f32 partial per-channel sums       (VMEM scratch)
    attn_ref: (C, 1)   f32 sigmoid(conv1d(mean))          (VMEM scratch)
    stash:    optional (C, HW_pad) copy of x in x.dtype   (VMEM scratch)
    """
    C, T = x_ref.shape
    pad = (k_size - 1) // 2
    phase = pl.program_id(1)
    t = pl.program_id(2)
    nt = pl.num_programs(2)
    stash_ref = stash[0] if use_stash else None
    off = pl.multiple_of(t * T, 128)

    @pl.when(phase == 0)
    def _reduce():
        @pl.when(t == 0)
        def _init():
            acc_ref[...] = jnp.zeros_like(acc_ref)

        # Accumulate 128-lane chunks on the VPU (ld/st slots are idle while the
        # kernel is DMA-bound); no per-tile cross-lane XLU reduce and no (C, T)
        # f32 temporary.  Padded lanes were zero-filled in the wrapper.
        for j in range(T // 128):
            acc_ref[...] += x_ref[:, j * 128:(j + 1) * 128].astype(jnp.float32)

        if use_stash:
            # Keep this tile resident so phase 1 never re-reads it from HBM.
            stash_ref[:, pl.ds(off, T)] = x_ref[...]

        @pl.when(t == nt - 1)
        def _finalize():
            # Single XLU cross-lane reduce per batch element.
            mean = jnp.sum(acc_ref[...], axis=-1, keepdims=True) * inv_hw  # (C,1)
            # Zero-padded 1D conv across channels as k shifted taps:
            #   conv[c] = sum_j w[j] * mean[c + j - pad]
            # Shifts run on the XLU (pltpu.roll); taps are SMEM scalars, so no
            # (C, C) banded matrix is built, DMA'd or double-buffered.
            c_idx = jax.lax.broadcasted_iota(jnp.int32, (C, 1), 0)
            conv = jnp.zeros_like(mean)
            for j in range(k_size):                           # static unroll, k small
                d = j - pad
                if d == 0:
                    term = mean
                else:
                    term = pltpu.roll(mean, shift=(-d) % C, axis=0)
                    valid = (c_idx + d >= 0) & (c_idx + d < C)
                    term = jnp.where(valid, term, 0.0)
                conv = conv + w_ref[j] * term
            attn_ref[...] = jax.nn.sigmoid(conv)              # (C, 1)

    @pl.when(phase == 1)
    def _scale():
        if use_stash:
            xv = stash_ref[:, pl.ds(off, T)]
        else:
            xv = x_ref[...]
        # Multiply in f32, cast the product (keeps bf16 inputs accurate).
        o_ref[...] = (xv.astype(jnp.float32) * attn_ref[...]).astype(o_ref.dtype)


def _vmem_budget_bytes() -> int:
    """Generation-aware VMEM budget (v7x has 64 MiB/TC vs 128 MiB on v5e/v6e)."""
    kind = ""
    try:
        kind = jax.devices()[0].device_kind.lower()
    except Exception:
        pass
    if "7" in kind:
        return 48 << 20      # leave headroom under 64 MiB
    if any(s in kind for s in ("v4", "v5", "v6")):
        return 96 << 20      # 128 MiB physical
    return 48 << 20          # unknown generation: be conservative


def _pick_hw_tile(hw_pad: int, c: int, itemsize: int) -> int:
    """Largest lane-dense tile T (multiple of 128 dividing hw_pad) with the
    (C, T) block <= ~4 MiB and T <= 2048 lanes, amortizing the ~0.35 us
    per-grid-step overhead while 4x blocks still fit scoped VMEM with margin."""
    m = hw_pad // 128
    cap = max(1, min(16, (4 << 20) // (itemsize * c * 128)))
    best = 1
    for d in range(1, m + 1):
        if m % d == 0 and d <= cap:
            best = d
    return 128 * best


@functools.partial(jax.jit, static_argnames=("k_size",))
def eia_layer_pallas(x, w, k_size=5):
    """x: (B, C, H, W); w: (k_size,) Conv1d(1, 1, k, bias=False) weights."""
    B, C, H, W = x.shape
    HW = H * W
    HW_pad = ((HW + 127) // 128) * 128
    itemsize = x.dtype.itemsize

    x_flat = x.reshape(B, C, HW)
    if HW_pad != HW:
        # Pad spatial axis to a lane multiple; zeros don't affect the sum
        # (inv_hw uses the true HW) and the pad is sliced off afterwards.
        x_flat = jnp.pad(x_flat, ((0, 0), (0, 0), (0, HW_pad - HW)))

    T = _pick_hw_tile(HW_pad, C, itemsize)
    nt = HW_pad // T

    # VMEM budgeting: stash + input/output double buffers + small scratch.
    budget = _vmem_budget_bytes()
    tile_bytes = C * T * itemsize
    stash_bytes = C * HW_pad * itemsize
    acc_bytes = 2 * (((C + 7) // 8) * 8) * 128 * 4
    base_need = 4 * tile_bytes + acc_bytes
    use_stash = (stash_bytes + base_need + (4 << 20)) <= budget
    need = base_need + (stash_bytes if use_stash else 0)
    vmem_limit = int(min(budget, max(need + (8 << 20), 32 << 20)))

    w32 = w.reshape(-1).astype(jnp.float32)
    kernel = functools.partial(_eca_kernel, k_size=k_size, inv_hw=1.0 / HW,
                               use_stash=use_stash)

    if use_stash:
        # Phase 1 reads tiles from the VMEM stash; pin the input block to the
        # last phase-0 tile so Pallas issues no phase-1 input DMAs at all
        # (HBM traffic = 2x tensor bytes).
        x_map = lambda b, p, t: (b, 0, t * (1 - p) + (nt - 1) * p)
    else:
        # Fallback: stream x again in phase 1 (3x traffic, only for huge slabs).
        x_map = lambda b, p, t: (b, 0, t)

    scratch = [pltpu.VMEM((C, 128), jnp.float32),   # partial channel sums
               pltpu.VMEM((C, 1), jnp.float32)]     # sigmoid(conv(mean))
    if use_stash:
        scratch.append(pltpu.VMEM((C, HW_pad), x.dtype))

    out_flat = pl.pallas_call(
        kernel,
        out_shape=jax.ShapeDtypeStruct((B, C, HW_pad), x.dtype),
        grid=(B, 2, nt),  # (batch, phase: reduce/scale, spatial tile)
        in_specs=[
            pl.BlockSpec((None, C, T), x_map),                       # x tiles
            pl.BlockSpec(memory_space=pltpu.MemorySpace.SMEM),       # conv taps
        ],
        # Phase 0: output pinned to block (b, 0) -> stays resident, no garbage
        # writeback. Phase 1: block (b, t) -> each output tile DMA'd to HBM once.
        out_specs=pl.BlockSpec((None, C, T), lambda b, p, t: (b, 0, t * p)),
        scratch_shapes=scratch,
        compiler_params=pltpu.CompilerParams(
            # Note: on v7x, CORE_PARALLEL on the batch axis would shard batches
            # across the 2 TensorCores; kept "parallel" here for portability
            # across generations.
            dimension_semantics=("parallel", "arbitrary", "arbitrary"),
            vmem_limit_bytes=vmem_limit,
        ),
        cost_estimate=pl.CostEstimate(
            flops=int(3 * B * C * HW_pad + 2 * B * C * k_size),
            transcendentals=int(B * C),
            bytes_accessed=int((2 if use_stash else 3) * B * C * HW_pad * itemsize),
        ),
    )(x_flat, w32)

    if HW_pad != HW:
        out_flat = out_flat[:, :, :HW]
    return out_flat.reshape(B, C, H, W)


def _reference(x, w, k_size=5):
    """Pure-JAX reference matching the PyTorch module semantics."""
    B, C, H, W = x.shape
    pad = (k_size - 1) // 2
    pooled = jnp.mean(x, axis=(2, 3))                      # (B, C)
    padded = jnp.pad(pooled, ((0, 0), (pad, pad)))         # (B, C + 2*pad)
    conv = jnp.stack(
        [jnp.sum(padded[:, c:c + k_size] * w, axis=-1) for c in range(C)],
        axis=-1,
    )                                                      # (B, C)
    attn = jax.nn.sigmoid(conv)
    return x * attn[:, :, None, None]


if __name__ == "__main__":
    key = jax.random.PRNGKey(0)
    kx, kw, kx2 = jax.random.split(key, 3)

    K_SIZE = 5
    # Deterministic Conv1d(1, 1, k) weight, shape (k,), uniform in +-1/sqrt(k)
    bound = 1.0 / math.sqrt(K_SIZE)
    w = jax.random.uniform(kw, (K_SIZE,), minval=-bound, maxval=bound,
                           dtype=jnp.float32)

    # Case 1: lane-aligned spatial size -> multi-tile resident-stash path
    # (HW=4096 -> T=2048, nt=2 per batch element).
    B, C, H, W = 2, 16, 64, 64
    x = jax.random.normal(kx, (B, C, H, W), dtype=jnp.float32)
    out = jax.block_until_ready(eia_layer_pallas(x, w, k_size=K_SIZE))
    ref = _reference(x, w, k_size=K_SIZE)
    assert out.shape == (B, C, H, W)
    assert jnp.allclose(out, ref, atol=1e-5, rtol=1e-5), "mismatch (aligned case)"

    # Case 2: HW not a multiple of 128 -> zero-padded lane-dense path.
    B2, C2, H2, W2 = 2, 8, 9, 9
    x2 = jax.random.normal(kx2, (B2, C2, H2, W2), dtype=jnp.float32)
    out2 = jax.block_until_ready(eia_layer_pallas(x2, w, k_size=K_SIZE))
    ref2 = _reference(x2, w, k_size=K_SIZE)
    assert out2.shape == (B2, C2, H2, W2)
    assert jnp.allclose(out2, ref2, atol=1e-5, rtol=1e-5), "mismatch (padded case)"

    print("KERNEL_OK")
</pallas_src>

<mosaic_0001>
module attributes {stable_mosaic.version = 11 : i64} {
  func.func @_eca_kernel(%arg0: i32, %arg1: i32, %arg2: i32, %arg3: memref<1x16x2048xf32, #tpu.memory_space<vmem>>, %arg4: memref<5xf32, #tpu.memory_space<smem>>, %arg5: memref<1x16x2048xf32, #tpu.memory_space<vmem>>, %arg6: memref<16x128xf32, #tpu.memory_space<vmem>>, %arg7: memref<16x1xf32, #tpu.memory_space<vmem>>, %arg8: memref<16x4096xf32, #tpu.memory_space<vmem>>) attributes {dimension_semantics = [#tpu.dimension_semantics<parallel>, #tpu.dimension_semantics<arbitrary>, #tpu.dimension_semantics<arbitrary>], iteration_bounds = array<i64: 2, 2, 2>, scalar_prefetch = 0 : i64, scratch_operands = 3 : i64, tpu.core_type = #tpu.core_type<tc>, window_params = [{transform_indices = @transform_0, window_bounds = array<i64: 1, 16, 2048>}, {transform_indices = @transform_1, window_bounds = array<i64: 5>}, {transform_indices = @transform_2, window_bounds = array<i64: 1, 16, 2048>}]} {
    %c2048_i32 = arith.constant 2048 : i32
    %0 = arith.muli %arg2, %c2048_i32 : i32
    %1 = tpu.assume_multiple %0, 128 : i32
    %c0_i32 = arith.constant 0 : i32
    %2 = arith.cmpi eq, %arg1, %c0_i32 : i32
    %3 = arith.extui %2 : i1 to i32
    %c0_i32_0 = arith.constant 0 : i32
    %4 = arith.cmpi ne, %3, %c0_i32_0 : i32
    scf.if %4 {
      %c0_i32_2 = arith.constant 0 : i32
      %8 = arith.cmpi eq, %arg2, %c0_i32_2 : i32
      %9 = arith.extui %8 : i1 to i32
      %c0_i32_3 = arith.constant 0 : i32
      %10 = arith.cmpi ne, %9, %c0_i32_3 : i32
      scf.if %10 {
        %cst = arith.constant 0.000000e+00 : f32
        %98 = vector.broadcast %cst : f32 to vector<16x128xf32>
        %c0_106 = arith.constant 0 : index
        %c0_107 = arith.constant 0 : index
        %99 = vector.load %arg6[%c0_106, %c0_107] : memref<16x128xf32, #tpu.memory_space<vmem>>, vector<16x128xf32>
        tpu.vector_store %arg6[%c0_106, %c0_107], %98 {strides = array<i32>} : memref<16x128xf32, #tpu.memory_space<vmem>>, vector<16x128xf32>,
      } else {
      }
      %c0 = arith.constant 0 : index
      %c0_4 = arith.constant 0 : index
      %11 = vector.load %arg6[%c0, %c0_4] : memref<16x128xf32, #tpu.memory_space<vmem>>, vector<16x128xf32>
      %c0_5 = arith.constant 0 : index
      %c0_6 = arith.constant 0 : index
      %c0_7 = arith.constant 0 : index
      %12 = vector.load %arg3[%c0_5, %c0_6, %c0_7] : memref<1x16x2048xf32, #tpu.memory_space<vmem>>, vector<1x16x128xf32>
      %13 = vector.shape_cast %12 : vector<1x16x128xf32> to vector<16x128xf32>
      %14 = arith.addf %11, %13 : vector<16x128xf32>
      %c0_8 = arith.constant 0 : index
      %c0_9 = arith.constant 0 : index
      %15 = vector.load %arg6[%c0_8, %c0_9] : memref<16x128xf32, #tpu.memory_space<vmem>>, vector<16x128xf32>
      tpu.vector_store %arg6[%c0_8, %c0_9], %14 {strides = array<i32>} : memref<16x128xf32, #tpu.memory_space<vmem>>, vector<16x128xf32>,
      %c0_10 = arith.constant 0 : index
      %c0_11 = arith.constant 0 : index
      %16 = vector.load %arg6[%c0_10, %c0_11] : memref<16x128xf32, #tpu.memory_space<vmem>>, vector<16x128xf32>
      %c0_12 = arith.constant 0 : index
      %c0_13 = arith.constant 0 : index
      %c128 = arith.constant 128 : index
      %17 = vector.load %arg3[%c0_12, %c0_13, %c128] : memref<1x16x2048xf32, #tpu.memory_space<vmem>>, vector<1x16x128xf32>
      %18 = vector.shape_cast %17 : vector<1x16x128xf32> to vector<16x128xf32>
      %19 = arith.addf %16, %18 : vector<16x128xf32>
      %c0_14 = arith.constant 0 : index
      %c0_15 = arith.constant 0 : index
      %20 = vector.load %arg6[%c0_14, %c0_15] : memref<16x128xf32, #tpu.memory_space<vmem>>, vector<16x128xf32>
      tpu.vector_store %arg6[%c0_14, %c0_15], %19 {strides = array<i32>} : memref<16x128xf32, #tpu.memory_space<vmem>>, vector<16x128xf32>,
      %c0_16 = arith.constant 0 : index
      %c0_17 = arith.constant 0 : index
      %21 = vector.load %arg6[%c0_16, %c0_17] : memref<16x128xf32, #tpu.memory_space<vmem>>, vector<16x128xf32>
      %c0_18 = arith.constant 0 : index
      %c0_19 = arith.constant 0 : index
      %c256 = arith.constant 256 : index
      %22 = vector.load %arg3[%c0_18, %c0_19, %c256] : memref<1x16x2048xf32, #tpu.memory_space<vmem>>, vector<1x16x128xf32>
      %23 = vector.shape_cast %22 : vector<1x16x128xf32> to vector<16x128xf32>
      %24 = arith.addf %21, %23 : vector<16x128xf32>
      %c0_20 = arith.constant 0 : index
      %c0_21 = arith.constant 0 : index
      %25 = vector.load %arg6[%c0_20, %c0_21] : memref<16x128xf32, #tpu.memory_space<vmem>>, vector<16x128xf32>
      tpu.vector_store %arg6[%c0_20, %c0_21], %24 {strides = array<i32>} : memref<16x128xf32, #tpu.memory_space<vmem>>, vector<16x128xf32>,
      %c0_22 = arith.constant 0 : index
      %c0_23 = arith.constant 0 : index
      %26 = vector.load %arg6[%c0_22, %c0_23] : memref<16x128xf32, #tpu.memory_space<vmem>>, vector<16x128xf32>
      %c0_24 = arith.constant 0 : index
      %c0_25 = arith.constant 0 : index
      %c384 = arith.constant 384 : index
      %27 = vector.load %arg3[%c0_24, %c0_25, %c384] : memref<1x16x2048xf32, #tpu.memory_space<vmem>>, vector<1x16x128xf32>
      %28 = vector.shape_cast %27 : vector<1x16x128xf32> to vector<16x128xf32>
      %29 = arith.addf %26, %28 : vector<16x128xf32>
      %c0_26 = arith.constant 0 : index
      %c0_27 = arith.constant 0 : index
      %30 = vector.load %arg6[%c0_26, %c0_27] : memref<16x128xf32, #tpu.memory_space<vmem>>, vector<16x128xf32>
      tpu.vector_store %arg6[%c0_26, %c0_27], %29 {strides = array<i32>} : memref<16x128xf32, #tpu.memory_space<vmem>>, vector<16x128xf32>,
      %c0_28 = arith.constant 0 : index
      %c0_29 = arith.constant 0 : index
      %31 = vector.load %arg6[%c0_28, %c0_29] : memref<16x128xf32, #tpu.memory_space<vmem>>, vector<16x128xf32>
      %c0_30 = arith.constant 0 : index
      %c0_31 = arith.constant 0 : index
      %c512 = arith.constant 512 : index
      %32 = vector.load %arg3[%c0_30, %c0_31, %c512] : memref<1x16x2048xf32, #tpu.memory_space<vmem>>, vector<1x16x128xf32>
      %33 = vector.shape_cast %32 : vector<1x16x128xf32> to vector<16x128xf32>
      %34 = arith.addf %31, %33 : vector<16x128xf32>
      %c0_32 = arith.constant 0 : index
      %c0_33 = arith.constant 0 : index
      %35 = vector.load %arg6[%c0_32, %c0_33] : memref<16x128xf32, #tpu.memory_space<vmem>>, vector<16x128xf32>
      tpu.vector_store %arg6[%c0_32, %c0_33], %34 {strides = array<i32>} : memref<16x128xf32, #tpu.memory_space<vmem>>, vector<16x128xf32>,
      %c0_34 = arith.constant 0 : index
      %c0_35 = arith.constant 0 : index
      %36 = vector.load %arg6[%c0_34, %c0_35] : memref<16x128xf32, #tpu.memory_space<vmem>>, vector<16x128xf32>
      %c0_36 = arith.constant 0 : index
      %c0_37 = arith.constant 0 : index
      %c640 = arith.constant 640 : index
      %37 = vector.load %arg3[%c0_36, %c0_37, %c640] : memref<1x16x2048xf32, #tpu.memory_space<vmem>>, vector<1x16x128xf32>
      %38 = vector.shape_cast %37 : vector<1x16x128xf32> to vector<16x128xf32>
      %39 = arith.addf %36, %38 : vector<16x128xf32>
      %c0_38 = arith.constant 0 : index
      %c0_39 = arith.constant 0 : index
      %40 = vector.load %arg6[%c0_38, %c0_39] : memref<16x128xf32, #tpu.memory_space<vmem>>, vector<16x128xf32>
      tpu.vector_store %arg6[%c0_38, %c0_39], %39 {strides = array<i32>} : memref<16x128xf32, #tpu.memory_space<vmem>>, vector<16x128xf32>,
      %c0_40 = arith.constant 0 : index
      %c0_41 = arith.constant 0 : index
      %41 = vector.load %arg6[%c0_40, %c0_41] : memref<16x128xf32, #tpu.memory_space<vmem>>, vector<16x128xf32>
      %c0_42 = arith.constant 0 : index
      %c0_43 = arith.constant 0 : index
      %c768 = arith.constant 768 : index
      %42 = vector.load %arg3[%c0_42, %c0_43, %c768] : memref<1x16x2048xf32, #tpu.memory_space<vmem>>, vector<1x16x128xf32>
      %43 = vector.shape_cast %42 : vector<1x16x128xf32> to vector<16x128xf32>
      %44 = arith.addf %41, %43 : vector<16x128xf32>
      %c0_44 = arith.constant 0 : index
      %c0_45 = arith.constant 0 : index
      %45 = vector.load %arg6[%c0_44, %c0_45] : memref<16x128xf32, #tpu.memory_space<vmem>>, vector<16x128xf32>
      tpu.vector_store %arg6[%c0_44, %c0_45], %44 {strides = array<i32>} : memref<16x128xf32, #tpu.memory_space<vmem>>, vector<16x128xf32>,
      %c0_46 = arith.constant 0 : index
      %c0_47 = arith.constant 0 : index
      %46 = vector.load %arg6[%c0_46, %c0_47] : memref<16x128xf32, #tpu.memory_space<vmem>>, vector<16x128xf32>
      %c0_48 = arith.constant 0 : index
      %c0_49 = arith.constant 0 : index
      %c896 = arith.constant 896 : index
      %47 = vector.load %arg3[%c0_48, %c0_49, %c896] : memref<1x16x2048xf32, #tpu.memory_space<vmem>>, vector<1x16x128xf32>
      %48 = vector.shape_cast %47 : vector<1x16x128xf32> to vector<16x128xf32>
      %49 = arith.addf %46, %48 : vector<16x128xf32>
      %c0_50 = arith.constant 0 : index
      %c0_51 = arith.constant 0 : index
      %50 = vector.load %arg6[%c0_50, %c0_51] : memref<16x128xf32, #tpu.memory_space<vmem>>, vector<16x128xf32>
      tpu.vector_store %arg6[%c0_50, %c0_51], %49 {strides = array<i32>} : memref<16x128xf32, #tpu.memory_space<vmem>>, vector<16x128xf32>,
      %c0_52 = arith.constant 0 : index
      %c0_53 = arith.constant 0 : index
      %51 = vector.load %arg6[%c0_52, %c0_53] : memref<16x128xf32, #tpu.memory_space<vmem>>, vector<16x128xf32>
      %c0_54 = arith.constant 0 : index
      %c0_55 = arith.constant 0 : index
      %c1024 = arith.constant 1024 : index
      %52 = vector.load %arg3[%c0_54, %c0_55, %c1024] : memref<1x16x2048xf32, #tpu.memory_space<vmem>>, vector<1x16x128xf32>
      %53 = vector.shape_cast %52 : vector<1x16x128xf32> to vector<16x128xf32>
      %54 = arith.addf %51, %53 : vector<16x128xf32>
      %c0_56 = arith.constant 0 : index
      %c0_57 = arith.constant 0 : index
      %55 = vector.load %arg6[%c0_56, %c0_57] : memref<16x128xf32, #tpu.memory_space<vmem>>, vector<16x128xf32>
      tpu.vector_store %arg6[%c0_56, %c0_57], %54 {strides = array<i32>} : memref<16x128xf32, #tpu.memory_space<vmem>>, vector<16x128xf32>,
      %c0_58 = arith.constant 0 : index
      %c0_59 = arith.constant 0 : index
      %56 = vector.load %arg6[%c0_58, %c0_59] : memref<16x128xf32, #tpu.memory_space<vmem>>, vector<16x128xf32>
      %c0_60 = arith.constant 0 : index
      %c0_61 = arith.constant 0 : index
      %c1152 = arith.constant 1152 : index
      %57 = vector.load %arg3[%c0_60, %c0_61, %c1152] : memref<1x16x2048xf32, #tpu.memory_space<vmem>>, vector<1x16x128xf32>
      %58 = vector.shape_cast %57 : vector<1x16x128xf32> to vector<16x128xf32>
      %59 = arith.addf %56, %58 : vector<16x128xf32>
      %c0_62 = arith.constant 0 : index
      %c0_63 = arith.constant 0 : index
      %60 = vector.load %arg6[%c0_62, %c0_63] : memref<16x128xf32, #tpu.memory_space<vmem>>, vector<16x128xf32>
      tpu.vector_store %arg6[%c0_62, %c0_63], %59 {strides = array<i32>} : memref<16x128xf32, #tpu.memory_space<vmem>>, vector<16x128xf32>,
      %c0_64 = arith.constant 0 : index
      %c0_65 = arith.constant 0 : index
      %61 = vector.load %arg6[%c0_64, %c0_65] : memref<16x128xf32, #tpu.memory_space<vmem>>, vector<16x128xf32>
      %c0_66 = arith.constant 0 : index
      %c0_67 = arith.constant 0 : index
      %c1280 = arith.constant 1280 : index
      %62 = vector.load %arg3[%c0_66, %c0_67, %c1280] : memref<1x16x2048xf32, #tpu.memory_space<vmem>>, vector<1x16x128xf32>
      %63 = vector.shape_cast %62 : vector<1x16x128xf32> to vector<16x128xf32>
      %64 = arith.addf %61, %63 : vector<16x128xf32>
      %c0_68 = arith.constant 0 : index
      %c0_69 = arith.constant 0 : index
      %65 = vector.load %arg6[%c0_68, %c0_69] : memref<16x128xf32, #tpu.memory_space<vmem>>, vector<16x128xf32>
      tpu.vector_store %arg6[%c0_68, %c0_69], %64 {strides = array<i32>} : memref<16x128xf32, #tpu.memory_space<vmem>>, vector<16x128xf32>,
      %c0_70 = arith.constant 0 : index
      %c0_71 = arith.constant 0 : index
      %66 = vector.load %arg6[%c0_70, %c0_71] : memref<16x128xf32, #tpu.memory_space<vmem>>, vector<16x128xf32>
      %c0_72 = arith.constant 0 : index
      %c0_73 = arith.constant 0 : index
      %c1408 = arith.constant 1408 : index
      %67 = vector.load %arg3[%c0_72, %c0_73, %c1408] : memref<1x16x2048xf32, #tpu.memory_space<vmem>>, vector<1x16x128xf32>
      %68 = vector.shape_cast %67 : vector<1x16x128xf32> to vector<16x128xf32>
      %69 = arith.addf %66, %68 : vector<16x128xf32>
      %c0_74 = arith.constant 0 : index
      %c0_75 = arith.constant 0 : index
      %70 = vector.load %arg6[%c0_74, %c0_75] : memref<16x128xf32, #tpu.memory_space<vmem>>, vector<16x128xf32>
      tpu.vector_store %arg6[%c0_74, %c0_75], %69 {strides = array<i32>} : memref<16x128xf32, #tpu.memory_space<vmem>>, vector<16x128xf32>,
      %c0_76 = arith.constant 0 : index
      %c0_77 = arith.constant 0 : index
      %71 = vector.load %arg6[%c0_76, %c0_77] : memref<16x128xf32, #tpu.memory_space<vmem>>, vector<16x128xf32>
      %c0_78 = arith.constant 0 : index
      %c0_79 = arith.constant 0 : index
      %c1536 = arith.constant 1536 : index
      %72 = vector.load %arg3[%c0_78, %c0_79, %c1536] : memref<1x16x2048xf32, #tpu.memory_space<vmem>>, vector<1x16x128xf32>
      %73 = vector.shape_cast %72 : vector<1x16x128xf32> to vector<16x128xf32>
      %74 = arith.addf %71, %73 : vector<16x128xf32>
      %c0_80 = arith.constant 0 : index
      %c0_81 = arith.constant 0 : index
      %75 = vector.load %arg6[%c0_80, %c0_81] : memref<16x128xf32, #tpu.memory_space<vmem>>, vector<16x128xf32>
      tpu.vector_store %arg6[%c0_80, %c0_81], %74 {strides = array<i32>} : memref<16x128xf32, #tpu.memory_space<vmem>>, vector<16x128xf32>,
      %c0_82 = arith.constant 0 : index
      %c0_83 = arith.constant 0 : index
      %76 = vector.load %arg6[%c0_82, %c0_83] : memref<16x128xf32, #tpu.memory_space<vmem>>, vector<16x128xf32>
      %c0_84 = arith.constant 0 : index
      %c0_85 = arith.constant 0 : index
      %c1664 = arith.constant 1664 : index
      %77 = vector.load %arg3[%c0_84, %c0_85, %c1664] : memref<1x16x2048xf32, #tpu.memory_space<vmem>>, vector<1x16x128xf32>
      %78 = vector.shape_cast %77 : vector<1x16x128xf32> to vector<16x128xf32>
      %79 = arith.addf %76, %78 : vector<16x128xf32>
      %c0_86 = arith.constant 0 : index
      %c0_87 = arith.constant 0 : index
      %80 = vector.load %arg6[%c0_86, %c0_87] : memref<16x128xf32, #tpu.memory_space<vmem>>, vector<16x128xf32>
      tpu.vector_store %arg6[%c0_86, %c0_87], %79 {strides = array<i32>} : memref<16x128xf32, #tpu.memory_space<vmem>>, vector<16x128xf32>,
      %c0_88 = arith.constant 0 : index
      %c0_89 = arith.constant 0 : index
      %81 = vector.load %arg6[%c0_88, %c0_89] : memref<16x128xf32, #tpu.memory_space<vmem>>, vector<16x128xf32>
      %c0_90 = arith.constant 0 : index
      %c0_91 = arith.constant 0 : index
      %c1792 = arith.constant 1792 : index
      %82 = vector.load %arg3[%c0_90, %c0_91, %c1792] : memref<1x16x2048xf32, #tpu.memory_space<vmem>>, vector<1x16x128xf32>
      %83 = vector.shape_cast %82 : vector<1x16x128xf32> to vector<16x128xf32>
      %84 = arith.addf %81, %83 : vector<16x128xf32>
      %c0_92 = arith.constant 0 : index
      %c0_93 = arith.constant 0 : index
      %85 = vector.load %arg6[%c0_92, %c0_93] : memref<16x128xf32, #tpu.memory_space<vmem>>, vector<16x128xf32>
      tpu.vector_store %arg6[%c0_92, %c0_93], %84 {strides = array<i32>} : memref<16x128xf32, #tpu.memory_space<vmem>>, vector<16x128xf32>,
      %c0_94 = arith.constant 0 : index
      %c0_95 = arith.constant 0 : index
      %86 = vector.load %arg6[%c0_94, %c0_95] : memref<16x128xf32, #tpu.memory_space<vmem>>, vector<16x128xf32>
      %c0_96 = arith.constant 0 : index
      %c0_97 = arith.constant 0 : index
      %c1920 = arith.constant 1920 : index
      %87 = vector.load %arg3[%c0_96, %c0_97, %c1920] : memref<1x16x2048xf32, #tpu.memory_space<vmem>>, vector<1x16x128xf32>
      %88 = vector.shape_cast %87 : vector<1x16x128xf32> to vector<16x128xf32>
      %89 = arith.addf %86, %88 : vector<16x128xf32>
      %c0_98 = arith.constant 0 : index
      %c0_99 = arith.constant 0 : index
      %90 = vector.load %arg6[%c0_98, %c0_99] : memref<16x128xf32, #tpu.memory_space<vmem>>, vector<16x128xf32>
      tpu.vector_store %arg6[%c0_98, %c0_99], %89 {strides = array<i32>} : memref<16x128xf32, #tpu.memory_space<vmem>>, vector<16x128xf32>,
      %c0_100 = arith.constant 0 : index
      %c0_101 = arith.constant 0 : index
      %c0_102 = arith.constant 0 : index
      %91 = vector.load %arg3[%c0_100, %c0_101, %c0_102] : memref<1x16x2048xf32, #tpu.memory_space<vmem>>, vector<1x16x2048xf32>
      %92 = vector.shape_cast %91 : vector<1x16x2048xf32> to vector<16x2048xf32>
      %c0_103 = arith.constant 0 : index
      %93 = arith.index_cast %1 : i32 to index
      %94 = vector.load %arg8[%c0_103, %93] : memref<16x4096xf32, #tpu.memory_space<vmem>>, vector<16x2048xf32>
      tpu.vector_store %arg8[%c0_103, %93], %92 {strides = array<i32>} : memref<16x4096xf32, #tpu.memory_space<vmem>>, vector<16x2048xf32>,
      %c1_i32_104 = arith.constant 1 : i32
      %95 = arith.cmpi eq, %arg2, %c1_i32_104 : i32
      %96 = arith.extui %95 : i1 to i32
      %c0_i32_105 = arith.constant 0 : i32
      %97 = arith.cmpi ne, %96, %c0_i32_105 : i32
      scf.if %97 {
        %c0_106 = arith.constant 0 : index
        %c0_107 = arith.constant 0 : index
        %98 = vector.load %arg6[%c0_106, %c0_107] : memref<16x128xf32, #tpu.memory_space<vmem>>, vector<16x128xf32>
        %cst = arith.constant dense<0.000000e+00> : vector<16xf32>
        %99 = vector.multi_reduction <add>, %98, %cst [1] : vector<16x128xf32> to vector<16xf32>
        %100 = vector.shape_cast %99 : vector<16xf32> to vector<16x1xf32>
        %cst_108 = arith.constant 2.44140625E-4 : f32
        %101 = vector.broadcast %cst_108 : f32 to vector<16x1xf32>
        %102 = arith.mulf %100, %101 : vector<16x1xf32>
        %103 = tpu.iota {dimensions = array<i32: 0>} : vector<16x1xi32>
        %cst_109 = arith.constant 0.000000e+00 : f32
        %104 = vector.broadcast %cst_109 : f32 to vector<16x1xf32>
        %c2_i32 = arith.constant 2 : i32
        %105 = tpu.dynamic_rotate %102 by %c2_i32 dim 0 : vector<16x1xf32>, i32 -> vector<16x1xf32>
        %c-2_i32 = arith.constant -2 : i32
        %106 = vector.broadcast %c-2_i32 : i32 to vector<16x1xi32>
        %107 = arith.addi %103, %106 : vector<16x1xi32>
        %c0_i32_110 = arith.constant 0 : i32
        %108 = vector.broadcast %c0_i32_110 : i32 to vector<16x1xi32>
        %109 = arith.cmpi sge, %107, %108 : vector<16x1xi32>
        %c-2_i32_111 = arith.constant -2 : i32
        %110 = vector.broadcast %c-2_i32_111 : i32 to vector<16x1xi32>
        %111 = arith.addi %103, %110 : vector<16x1xi32>
        %c16_i32 = arith.constant 16 : i32
        %112 = vector.broadcast %c16_i32 : i32 to vector<16x1xi32>
        %113 = arith.cmpi slt, %111, %112 : vector<16x1xi32>
        %114 = arith.andi %109, %113 : vector<16x1xi1>
        %cst_112 = arith.constant 0.000000e+00 : f32
        %115 = vector.broadcast %cst_112 : f32 to vector<16x1xf32>
        %116 = arith.select %114, %105, %115 : vector<16x1xi1>, vector<16x1xf32>
        %c0_113 = arith.constant 0 : index
        %117 = memref.load %arg4[%c0_113] : memref<5xf32, #tpu.memory_space<smem>>
        %118 = vector.broadcast %117 : f32 to vector<16x1xf32>
        %119 = arith.mulf %118, %116 : vector<16x1xf32>
        %120 = arith.addf %104, %119 : vector<16x1xf32>
        %c1_i32_114 = arith.constant 1 : i32
        %121 = tpu.dynamic_rotate %102 by %c1_i32_114 dim 0 : vector<16x1xf32>, i32 -> vector<16x1xf32>
        %c-1_i32 = arith.constant -1 : i32
        %122 = vector.broadcast %c-1_i32 : i32 to vector<16x1xi32>
        %123 = arith.addi %103, %122 : vector<16x1xi32>
        %c0_i32_115 = arith.constant 0 : i32
        %124 = vector.broadcast %c0_i32_115 : i32 to vector<16x1xi32>
        %125 = arith.cmpi sge, %123, %124 : vector<16x1xi32>
        %c-1_i32_116 = arith.constant -1 : i32
        %126 = vector.broadcast %c-1_i32_116 : i32 to vector<16x1xi32>
        %127 = arith.addi %103, %126 : vector<16x1xi32>
        %c16_i32_117 = arith.constant 16 : i32
        %128 = vector.broadcast %c16_i32_117 : i32 to vector<16x1xi32>
        %129 = arith.cmpi slt, %127, %128 : vector<16x1xi32>
        %130 = arith.andi %125, %129 : vector<16x1xi1>
        %cst_118 = arith.constant 0.000000e+00 : f32
        %131 = vector.broadcast %cst_118 : f32 to vector<16x1xf32>
        %132 = arith.select %130, %121, %131 : vector<16x1xi1>, vector<16x1xf32>
        %c1 = arith.constant 1 : index
        %133 = memref.load %arg4[%c1] : memref<5xf32, #tpu.memory_space<smem>>
        %134 = vector.broadcast %133 : f32 to vector<16x1xf32>
        %135 = arith.mulf %134, %132 : vector<16x1xf32>
        %136 = arith.addf %120, %135 : vector<16x1xf32>
        %c2 = arith.constant 2 : index
        %137 = memref.load %arg4[%c2] : memref<5xf32, #tpu.memory_space<smem>>
        %138 = vector.broadcast %137 : f32 to vector<16x1xf32>
        %139 = arith.mulf %138, %102 : vector<16x1xf32>
        %140 = arith.addf %136, %139 : vector<16x1xf32>
        %c15_i32 = arith.constant 15 : i32
        %141 = tpu.dynamic_rotate %102 by %c15_i32 dim 0 : vector<16x1xf32>, i32 -> vector<16x1xf32>
        %c1_i32_119 = arith.constant 1 : i32
        %142 = vector.broadcast %c1_i32_119 : i32 to vector<16x1xi32>
        %143 = arith.addi %103, %142 : vector<16x1xi32>
        %c0_i32_120 = arith.constant 0 : i32
        %144 = vector.broadcast %c0_i32_120 : i32 to vector<16x1xi32>
        %145 = arith.cmpi sge, %143, %144 : vector<16x1xi32>
        %c1_i32_121 = arith.constant 1 : i32
        %146 = vector.broadcast %c1_i32_121 : i32 to vector<16x1xi32>
        %147 = arith.addi %103, %146 : vector<16x1xi32>
        %c16_i32_122 = arith.constant 16 : i32
        %148 = vector.broadcast %c16_i32_122 : i32 to vector<16x1xi32>
        %149 = arith.cmpi slt, %147, %148 : vector<16x1xi32>
        %150 = arith.andi %145, %149 : vector<16x1xi1>
        %cst_123 = arith.constant 0.000000e+00 : f32
        %151 = vector.broadcast %cst_123 : f32 to vector<16x1xf32>
        %152 = arith.select %150, %141, %151 : vector<16x1xi1>, vector<16x1xf32>
        %c3 = arith.constant 3 : index
        %153 = memref.load %arg4[%c3] : memref<5xf32, #tpu.memory_space<smem>>
        %154 = vector.broadcast %153 : f32 to vector<16x1xf32>
        %155 = arith.mulf %154, %152 : vector<16x1xf32>
        %156 = arith.addf %140, %155 : vector<16x1xf32>
        %c14_i32 = arith.constant 14 : i32
        %157 = tpu.dynamic_rotate %102 by %c14_i32 dim 0 : vector<16x1xf32>, i32 -> vector<16x1xf32>
        %c2_i32_124 = arith.constant 2 : i32
        %158 = vector.broadcast %c2_i32_124 : i32 to vector<16x1xi32>
        %159 = arith.addi %103, %158 : vector<16x1xi32>
        %c0_i32_125 = arith.constant 0 : i32
        %160 = vector.broadcast %c0_i32_125 : i32 to vector<16x1xi32>
        %161 = arith.cmpi sge, %159, %160 : vector<16x1xi32>
        %c2_i32_126 = arith.constant 2 : i32
        %162 = vector.broadcast %c2_i32_126 : i32 to vector<16x1xi32>
        %163 = arith.addi %103, %162 : vector<16x1xi32>
        %c16_i32_127 = arith.constant 16 : i32
        %164 = vector.broadcast %c16_i32_127 : i32 to vector<16x1xi32>
        %165 = arith.cmpi slt, %163, %164 : vector<16x1xi32>
        %166 = arith.andi %161, %165 : vector<16x1xi1>
        %cst_128 = arith.constant 0.000000e+00 : f32
        %167 = vector.broadcast %cst_128 : f32 to vector<16x1xf32>
        %168 = arith.select %166, %157, %167 : vector<16x1xi1>, vector<16x1xf32>
        %c4 = arith.constant 4 : index
        %169 = memref.load %arg4[%c4] : memref<5xf32, #tpu.memory_space<smem>>
        %170 = vector.broadcast %169 : f32 to vector<16x1xf32>
        %171 = arith.mulf %170, %168 : vector<16x1xf32>
        %172 = arith.addf %156, %171 : vector<16x1xf32>
        %173 = arith.negf %172 : vector<16x1xf32>
        %174 = math.exp %173 : vector<16x1xf32>
        %cst_129 = arith.constant 1.000000e+00 : f32
        %175 = vector.broadcast %cst_129 : f32 to vector<16x1xf32>
        %176 = arith.addf %175, %174 : vector<16x1xf32>
        %177 = arith.divf %175, %176 : vector<16x1xf32>
        %c0_130 = arith.constant 0 : index
        %c0_131 = arith.constant 0 : index
        %178 = vector.load %arg7[%c0_130, %c0_131] : memref<16x1xf32, #tpu.memory_space<vmem>>, vector<16x1xf32>
        tpu.vector_store %arg7[%c0_130, %c0_131], %177 {strides = array<i32>} : memref<16x1xf32, #tpu.memory_space<vmem>>, vector<16x1xf32>,
      } else {
      }
    } else {
    }
    %c1_i32 = arith.constant 1 : i32
    %5 = arith.cmpi eq, %arg1, %c1_i32 : i32
    %6 = arith.extui %5 : i1 to i32
    %c0_i32_1 = arith.constant 0 : i32
    %7 = arith.cmpi ne, %6, %c0_i32_1 : i32
    scf.if %7 {
      %c0 = arith.constant 0 : index
      %8 = arith.index_cast %1 : i32 to index
      %9 = vector.load %arg8[%c0, %8] : memref<16x4096xf32, #tpu.memory_space<vmem>>, vector<16x2048xf32>
      %c0_2 = arith.constant 0 : index
      %c0_3 = arith.constant 0 : index
      %10 = vector.load %arg7[%c0_2, %c0_3] : memref<16x1xf32, #tpu.memory_space<vmem>>, vector<16x1xf32>
      %11 = vector.broadcast %10 : vector<16x1xf32> to vector<16x2048xf32>
      %12 = arith.mulf %9, %11 : vector<16x2048xf32>
      %c0_4 = arith.constant 0 : index
      %c0_5 = arith.constant 0 : index
      %c0_6 = arith.constant 0 : index
      %13 = vector.load %arg5[%c0_4, %c0_5, %c0_6] : memref<1x16x2048xf32, #tpu.memory_space<vmem>>, vector<1x16x2048xf32>
      %14 = vector.shape_cast %13 : vector<1x16x2048xf32> to vector<16x2048xf32>
      %15 = vector.shape_cast %12 : vector<16x2048xf32> to vector<1x16x2048xf32>
      tpu.vector_store %arg5[%c0_4, %c0_5, %c0_6], %15 {strides = array<i32>} : memref<1x16x2048xf32, #tpu.memory_space<vmem>>, vector<1x16x2048xf32>,
    } else {
    }
    return
  }
  func.func @transform_0(%arg0: i32, %arg1: i32, %arg2: i32) -> (i32, i32, i32) {
    %c1_i32 = arith.constant 1 : i32
    %0 = arith.subi %c1_i32, %arg1 : i32
    %1 = arith.muli %arg2, %0 : i32
    %c1_i32_0 = arith.constant 1 : i32
    %2 = arith.muli %c1_i32_0, %arg1 : i32
    %3 = arith.addi %1, %2 : i32
    %c0_i32 = arith.constant 0 : i32
    %c0_i32_1 = arith.constant 0 : i32
    return %arg0, %c0_i32, %3 : i32, i32, i32
  }
  func.func @transform_1(%arg0: i32, %arg1: i32, %arg2: i32) -> i32 {
    %c0_i32 = arith.constant 0 : i32
    %c0_i32_0 = arith.constant 0 : i32
    return %c0_i32 : i32
  }
  func.func @transform_2(%arg0: i32, %arg1: i32, %arg2: i32) -> (i32, i32, i32) {
    %0 = arith.muli %arg2, %arg1 : i32
    %c0_i32 = arith.constant 0 : i32
    %c0_i32_0 = arith.constant 0 : i32
    return %arg0, %c0_i32, %0 : i32, i32, i32
  }
}

</mosaic_0001>

<bundles_post_ra>
// kernel: eia_layer_pallas.1
= control target key start
LH: loop header
LB: loop body
LE: loop exit
PB: predicated region body
PF: predicated region fallthrough
CT: control target
= control target key end

     0   :  { %s1688_s0 = inlined_call_operand.vmem [shape: f32[2,16,4096], index: 0, kind: input, shape index: {}]   ;;  %s1689_s1 = inlined_call_operand.vmem [shape: f32[5], index: 1, kind: input, shape index: {}]   ;;  %s1690_s2 = inlined_call_operand.vmem [shape: f32[2,16,4096], index: 2, kind: output, shape index: {}]  }
   0x1   :  { %1694 = sst [smem:[#allocation13_spill]] %s1689_s1 }
   0x2   :  { %7 = vsyncpa [#allocation7], 0  ;;  %s1201_s9 = smov 0   ;;  %s1203_s10 = smov 0  }
   0x3   :  { %s1205_s11 = smov 0   ;;  %s1207_s12 = smov 0  }
   0x4   :  { %s1209_s13 = smov 0   ;;  %s1211_s14 = smov 0  }
   0x5   :  { %s1213_s15 = smov 0   ;;  %s1215_s16 = smov 0  }
   0x6   :  { %s1217_s17 = smov 0   ;;  %s1219_s18 = smov 0  }
   0x7   :  { %s1221_s19 = smov 0  }
   0x8 LB: > { %1695 = sst [smem:[#allocation10_spill]] %s1169_s16  ;;  %s25_s21 = sadd.s32 1, %s1169_s16  ;;  %s1181_s19 = sphi %s1221_s19, %s13_s19   ;;  %s1177_s18 = sphi %s1219_s18, %s1715_s18   ;;  %s1173_s17 = sphi %s1217_s17, %s1714_s17   ;;  %s1169_s16 = sphi %s1215_s16, %s1713_s16   ;;  %s1165_s15 = sphi %s1213_s15, %s1712_s15   ;;  %s1161_s14 = sphi %s1211_s14, %s1706_s14   ;;  %s1157_s13 = sphi %s1209_s13, %s1705_s13   ;;  %s1153_s12 = sphi %s1207_s12, %s1711_s12   ;;  %s1149_s11 = sphi %s1205_s11, %s1710_s11   ;;  %s1145_s10 = sphi %s1203_s10, %s1709_s10   ;;  %s1141_s9 = sphi %s1201_s9, %s1708_s9  }
   0x9   : > { %1696 = sst [smem:[#allocation11_spill]] %s1173_s17  ;;  %p26_p0 = scmp.ge.s32.totalorder %s25_s21, 2 }
   0xa   : > { %s28_s22 = sadd.s32 1, %s1173_s17  ;;  %s32_s23 = sadd.s32 1, %s1177_s18 }
   0xb   : > { %s36_s24 = ssub.s32 1, %s1173_s17  ;;  %s1717_s21 = smov (%p26_p0, %s25_s21), 0 }
   0xc   : > { %s1719_s22 = smov (!%p26_p0, %s28_s22), %s1173_s17  ;;  %s37_s25 = smul.u32 %s1169_s16, %s36_s24 }
   0xd   : > { %s47_s26 = sadd.s32 1, %s1153_s12  ;;  %p30_p1 = scmp.ge.s32.totalorder %s1719_s22, 2 }
   0xe   : > { %p54_p2 = scmp.ne.s32.totalorder %s1153_s12, %s1149_s11  ;;  %s1269_s27 = sadd.s32 %s1173_s17, %s37_s25 }
   0xf   : > { %p55_p3 = scmp.eq.s32.totalorder %s1181_s19, 0  ;;  %s1721_s22 = smov (%p30_p1, %s1719_s22), 0 }
  0x10   : > { %s1723_s23 = smov (!%p30_p1, %s32_s23), %s1177_s18  ;;  %s39_s28 = ssub.s32 1, %s1721_s22 }
  0x11   : > { %p1276_p4 = por %p55_p3, %p54_p2  ;;  %p34_p5 = scmp.ge.s32.totalorder %s1723_s23, 2 }
  0x12   : > { %s40_s30 = smul.u32 %s39_s28, %s1717_s21  ;;  %s98_s4 = sadd.s32 1, %s1145_s10 }
  0x13   : > { %s91_s3 = smul.u32 %s1169_s16, %s1173_s17  ;;  %s1725_s23 = smov (%p34_p5, %s1723_s23), 0 }
  0x14   : > { %1698 = sst [smem:[#allocation12_spill]] %s1725_s23  ;;  %s41_s5 = sadd.s32 %s40_s30, %s1721_s22 }
  0x15   : > { %s92_s6 = smul.u32 %s1721_s22, %s1717_s21  ;;  %s42_s7 = ssub.s32 %s1177_s18, %s1725_s23 }
  0x16   : > { %s43_s8 = ssub.s32 %s1269_s27, %s41_s5  ;;  %p108_p8 = scmp.ne.s32.totalorder %s1145_s10, %s1141_s9 }
  0x17   : > { %s44_s24 = sor.u32 %s43_s8, %s42_s7  ;;  %s94_s25 = ssub.s32 %s91_s3, %s92_s6 }
  0x18   : > { %p45_p6 = scmp.eq.s32.totalorder %s44_s24, 0  ;;  %s95_s20 = sor.u32 %s94_s25, %s42_s7 }
  0x19   : > { %p96_p7 = scmp.eq.s32.totalorder %s95_s20, 0  ;;  %s1699_s16 = sadd.s32 4294967295, %s1181_s19  }
  0x1a   : > { %s1295_s28 = scalar_select %p45_p6, %s1153_s12, %s47_s26  }
  0x1b   : > { %s1298_s17 = scalar_select %p96_p7, %s1145_s10, %s98_s4  }
  0x1c   : > { %p109_p9 = scmp.eq.s32.totalorder %s1699_s16, 7  ;;  %p936_p10 = scmp.ge.s32.totalorder %s1181_s19, 1 }
  0x1d   : > { %p122_p11 = scmp.lt.s32.totalorder %s1181_s19, 9  ;;  %s1701_s23 = smov %s1699_s16 }
  0x1e   : > { %p1304_p12 = por %p109_p9, %p108_p8  ;;  %p1310_p13 = scmp.eq.s32.totalorder %s1701_s23, 0 }
  0x1f   : > { %p1314_p0 = pnand %p936_p10, %p122_p11  ;;  %s1704_s1 = sld [smem:[#allocation13_spill]] }
  0x20   : > { %s1183_s4 = smov [#allocation6]   ;;  %p938_p3 = scmp.ge.s32.totalorder %s1181_s19, 8 }
  0x21   : > { %p970_p1 = pneg %p1314_p0 }
  0x22   : > { %141 = sbr.rel (%p938_p3) target bundleno = 78 (0x4e), region = 20 }
  0x23   : > { %p971_p2 = pnand %p1310_p13, %p970_p1 }
  0x25   : > { %s134_s16 = sshll.u32 %s1704_s1, 4  ;;  %s135_s16 = int_to_ptr.vmem [resolvable:$true] %s134_s16 }
  0x26   : > { %973 = dma.vmem_to_smem (!%p971_p2), %s135_s16, 16, %s1183_s4, [#allocation7]  }
  0x27   : > { %144 = sbr.rel (!%p1276_p4) target bundleno = 78 (0x4e), region = 24  ;;  %s146_s23 = sand.u32 (%p1276_p4), 1, %s1153_s12  }
  0x28   : > { %s940_s6 = sshll.u32 (%p1276_p4), %s1269_s27, 4  ;;  %s939_s7 = sshll.u32 (%p1276_p4), %s146_s23, 8 }
  0x29   : > { %s941_s8 = sshll.u32 (%p1276_p4), %s1177_s18, 6  ;;  %s1339_s27 = scalar_lea.vmem (%p1276_p4), [#allocation5], %s939_s7 }
  0x2a   : > { %s154_s24 = sadd.s32 (%p1276_p4), %s941_s8, %s940_s6 }
  0x2b   : > { %s942_s25 = sshll.u32 (%p1276_p4), %s154_s24, 3 }
  0x2c   : > { %s1334_s1 = scalar_lea.vmem %s1688_s0, %s942_s25 }
  0x2d   : > { %v169_v0 = vld [vmem:[%s1334_s1] sm:$0xff]  ;;  %v171_v1 = vld [vmem:[%s1334_s1 + $0x8] sm:$0xff]  ;;  %v173_v2 = vld [vmem:[%s1334_s1 + $0x10] sm:$0xff] }
  0x2e   : > { %170 = vst [vmem:[%s1339_s27] sm:$0xff] %v169_v0  ;;  %v175_v3 = vld [vmem:[%s1334_s1 + $0x18] sm:$0xff]  ;;  %v177_v4 = vld [vmem:[%s1334_s1 + $0x20] sm:$0xff]  ;;  %v179_v5 = vld [vmem:[%s1334_s1 + $0x28] sm:$0xff] }
  0x2f   : > { %172 = vst [vmem:[%s1339_s27 + $0x8] sm:$0xff] %v171_v1  ;;  %v181_v6 = vld [vmem:[%s1334_s1 + $0x30] sm:$0xff]  ;;  %v183_v7 = vld [vmem:[%s1334_s1 + $0x38] sm:$0xff]  ;;  %v185_v8 = vld [vmem:[%s1334_s1 + $0x40] sm:$0xff] }
  0x30   : > { %174 = vst [vmem:[%s1339_s27 + $0x10] sm:$0xff] %v173_v2  ;;  %v187_v9 = vld [vmem:[%s1334_s1 + $0x48] sm:$0xff]  ;;  %v189_v10 = vld [vmem:[%s1334_s1 + $0x50] sm:$0xff]  ;;  %v191_v11 = vld [vmem:[%s1334_s1 + $0x58] sm:$0xff] }
  0x31   : > { %176 = vst [vmem:[%s1339_s27 + $0x18] sm:$0xff] %v175_v3  ;;  %v193_v12 = vld [vmem:[%s1334_s1 + $0x60] sm:$0xff]  ;;  %v195_v13 = vld [vmem:[%s1334_s1 + $0x68] sm:$0xff]  ;;  %v197_v14 = vld [vmem:[%s1334_s1 + $0x70] sm:$0xff] }
  0x32   : > { %178 = vst [vmem:[%s1339_s27 + $0x20] sm:$0xff] %v177_v4  ;;  %v199_v15 = vld [vmem:[%s1334_s1 + $0x78] sm:$0xff]  ;;  %v201_v16 = vld [vmem:[%s1334_s1 + $0x100] sm:$0xff]  ;;  %v203_v17 = vld [vmem:[%s1334_s1 + $0x108] sm:$0xff] }
  0x33   : > { %180 = vst [vmem:[%s1339_s27 + $0x28] sm:$0xff] %v179_v5  ;;  %v205_v18 = vld [vmem:[%s1334_s1 + $0x110] sm:$0xff]  ;;  %v207_v19 = vld [vmem:[%s1334_s1 + $0x118] sm:$0xff]  ;;  %v209_v20 = vld [vmem:[%s1334_s1 + $0x120] sm:$0xff] }
  0x34   : > { %182 = vst [vmem:[%s1339_s27 + $0x30] sm:$0xff] %v181_v6  ;;  %v211_v21 = vld [vmem:[%s1334_s1 + $0x128] sm:$0xff]  ;;  %v213_v22 = vld [vmem:[%s1334_s1 + $0x130] sm:$0xff]  ;;  %v215_v23 = vld [vmem:[%s1334_s1 + $0x138] sm:$0xff] }
  0x35   : > { %184 = vst [vmem:[%s1339_s27 + $0x38] sm:$0xff] %v183_v7  ;;  %v217_v24 = vld [vmem:[%s1334_s1 + $0x140] sm:$0xff]  ;;  %v219_v25 = vld [vmem:[%s1334_s1 + $0x148] sm:$0xff]  ;;  %v221_v26 = vld [vmem:[%s1334_s1 + $0x150] sm:$0xff] }
  0x36   : > { %186 = vst [vmem:[%s1339_s27 + $0x40] sm:$0xff] %v185_v8  ;;  %v223_v27 = vld [vmem:[%s1334_s1 + $0x158] sm:$0xff]  ;;  %v225_v28 = vld [vmem:[%s1334_s1 + $0x160] sm:$0xff]  ;;  %v227_v29 = vld [vmem:[%s1334_s1 + $0x168] sm:$0xff] }
  0x37   : > { %188 = vst [vmem:[%s1339_s27 + $0x48] sm:$0xff] %v187_v9  ;;  %v229_v30 = vld [vmem:[%s1334_s1 + $0x170] sm:$0xff]  ;;  %v231_v31 = vld [vmem:[%s1334_s1 + $0x178] sm:$0xff] }
  0x38   : > { %190 = vst [vmem:[%s1339_s27 + $0x50] sm:$0xff] %v189_v10 }
  0x39   : > { %192 = vst [vmem:[%s1339_s27 + $0x58] sm:$0xff] %v191_v11 }
  0x3a   : > { %194 = vst [vmem:[%s1339_s27 + $0x60] sm:$0xff] %v193_v12 }
  0x3b   : > { %196 = vst [vmem:[%s1339_s27 + $0x68] sm:$0xff] %v195_v13 }
  0x3c   : > { %198 = vst [vmem:[%s1339_s27 + $0x70] sm:$0xff] %v197_v14 }
  0x3d   : > { %200 = vst [vmem:[%s1339_s27 + $0x78] sm:$0xff] %v199_v15 }
  0x3e   : > { %202 = vst [vmem:[%s1339_s27 + $0x80] sm:$0xff] %v201_v16 }
  0x3f   : > { %204 = vst [vmem:[%s1339_s27 + $0x88] sm:$0xff] %v203_v17 }
  0x40   : > { %206 = vst [vmem:[%s1339_s27 + $0x90] sm:$0xff] %v205_v18 }
  0x41   : > { %208 = vst [vmem:[%s1339_s27 + $0x98] sm:$0xff] %v207_v19 }
  0x42   : > { %210 = vst [vmem:[%s1339_s27 + $0xa0] sm:$0xff] %v209_v20 }
  0x43   : > { %212 = vst [vmem:[%s1339_s27 + $0xa8] sm:$0xff] %v211_v21 }
  0x44   : > { %214 = vst [vmem:[%s1339_s27 + $0xb0] sm:$0xff] %v213_v22 }
  0x45   : > { %216 = vst [vmem:[%s1339_s27 + $0xb8] sm:$0xff] %v215_v23 }
  0x46   : > { %218 = vst [vmem:[%s1339_s27 + $0xc0] sm:$0xff] %v217_v24 }
  0x47   : > { %220 = vst [vmem:[%s1339_s27 + $0xc8] sm:$0xff] %v219_v25 }
  0x48   : > { %222 = vst [vmem:[%s1339_s27 + $0xd0] sm:$0xff] %v221_v26 }
  0x49   : > { %224 = vst [vmem:[%s1339_s27 + $0xd8] sm:$0xff] %v223_v27 }
  0x4a   : > { %226 = vst [vmem:[%s1339_s27 + $0xe0] sm:$0xff] %v225_v28 }
  0x4b   : > { %228 = vst [vmem:[%s1339_s27 + $0xe8] sm:$0xff] %v227_v29 }
  0x4c   : > { %230 = vst [vmem:[%s1339_s27 + $0xf0] sm:$0xff] %v229_v30 }
  0x4d   : > { %232 = vst [vmem:[%s1339_s27 + $0xf8] sm:$0xff] %v231_v31 }
  0x4e PF: > { %241 = sbr.rel (%p1314_p0) target bundleno = 514 (0x202), region = 47  ;;  %s244_s29 = sand.u32 (!%p1314_p0), 1, %s1149_s11  }
  0x4f   : > { %s944_s16 = sshll.u32 (!%p1314_p0), %s244_s29, 8 }
  0x50   : > { %s1405_s4 = scalar_lea.vmem (!%p1314_p0), [#allocation5], %s944_s16 }
  0x53   : > { %1136 = dma.done.wait (%p1310_p13), [#allocation7], 16  }
  0x54   : > { %1138 = vsyncadd (%p1310_p13), [#allocation7], 4294967280 }
  0x55   : > { %255 = sfence }
  0x56   : > { %s267_s1 = sand.u32 1, %s1141_s9   ;;  %s947_s23 = sshll.u32 %s1157_s13, 11 }
  0x57   : > { %s946_s6 = sshll.u32 %s267_s1, 8  ;;  %p948_p4 = scmp.ne.s32.totalorder %s1161_s14, 0 }
  0x58   : > { %s1413_s7 = scalar_lea.vmem [#allocation8], %s946_s6  ;;  %p949_p5 = scmp.ne.s32.totalorder (!%p948_p4), %s1157_s13, 0 }
  0x59   : > { %280 = sbr.rel (%p948_p4) target bundleno = 317 (0x13d), region = 59 }
  0x5e   : > { %284 = sbr.rel (%p949_p5) target bundleno = 102 (0x66), region = 63 }
  0x63   : > { %v1184_v32 = vmov 0.0  }
  0x64   : > { %285 = vst [vmem:[#allocation2] sm:$0xff] %v1184_v32 }
  0x65   : > { %286 = vst [vmem:[#allocation2 + $0x8] sm:$0xff] %v1184_v32 }
  0x66 PF: > { %v289_v34 = vld [vmem:[%s1405_s4] sm:$0xff]  ;;  %s447_s9 = sshra.s32 %s947_s23, 7  ;;  %v297_v38 = vld [vmem:[%s1405_s4 + $0x8] sm:$0xff]  ;;  %v305_v41 = vld [vmem:[%s1405_s4 + $0x10] sm:$0xff]  ;;  %p951_p6 = scmp.ne.s32.totalorder %s1157_s13, 1 }
  0x67   : > { %v290_v37 = vld [vmem:[%s1405_s4 + $0x80] sm:$0xff]  ;;  %v298_v39 = vld [vmem:[%s1405_s4 + $0x88] sm:$0xff]  ;;  %s950_s11 = sshll.u32 %s447_s9, 3  ;;  %v306_v43 = vld [vmem:[%s1405_s4 + $0x90] sm:$0xff]  ;;  %s1486_s20 = sld [smem:[#allocation6 + $0x2]] (!%p951_p6) }
  0x68   : > { %s1425_s5 = scalar_lea.vmem [#allocation4], %s950_s11  ;;  %v313_v45 = vld [vmem:[%s1405_s4 + $0x18] sm:$0xff]  ;;  %v321_v49 = vld [vmem:[%s1405_s4 + $0x20] sm:$0xff]  ;;  %v329_v52 = vld [vmem:[%s1405_s4 + $0x28] sm:$0xff]  ;;  %s1488_s8 = sld [smem:[#allocation6]] (!%p951_p6) }
  0x69   : > { %451 = vst [vmem:[%s1425_s5] sm:$0xff] %v289_v34  ;;  %v314_v47 = vld [vmem:[%s1405_s4 + $0x98] sm:$0xff]  ;;  %v322_v51 = vld [vmem:[%s1405_s4 + $0xa0] sm:$0xff]  ;;  %v337_v54 = vld [vmem:[%s1405_s4 + $0x30] sm:$0xff]  ;;  %s1490_s24 = sld [smem:[#allocation6 + $0x1]] (!%p951_p6) }
  0x6a   : > { %452 = vst [vmem:[%s1425_s5 + $0x8] sm:$0xff] %v297_v38  ;;  %v330_v56 = vld [vmem:[%s1405_s4 + $0xa8] sm:$0xff]  ;;  %v345_v57 = vld [vmem:[%s1405_s4 + $0x38] sm:$0xff]  ;;  %v353_v59 = vld [vmem:[%s1405_s4 + $0x40] sm:$0xff]  ;;  %s1492_s25 = sld [smem:[#allocation6 + $0x3]] (!%p951_p6) }
  0x6b   : > { %v287_v33 = vld [vmem:[#allocation2] sm:$0xff]  ;;  %453 = vst [vmem:[%s1425_s5 + $0x10] sm:$0xff] %v305_v41  ;;  %v338_v61 = vld [vmem:[%s1405_s4 + $0xb0] sm:$0xff]  ;;  %v361_v62 = vld [vmem:[%s1405_s4 + $0x48] sm:$0xff]  ;;  %s1498_s26 = sld [smem:[#allocation6 + $0x4]] (!%p951_p6) }
  0x6c   : > { %v288_v35 = vld [vmem:[#allocation2 + $0x8] sm:$0xff]  ;;  %v291_v36 = vadd.f32 %v289_v34, %v287_v33  ;;  %454 = vst [vmem:[%s1425_s5 + $0x18] sm:$0xff] %v313_v45  ;;  %v369_v0 = vld [vmem:[%s1405_s4 + $0x50] sm:$0xff]  ;;  %v346_v2 = vld [vmem:[%s1405_s4 + $0xb8] sm:$0xff] }
  0x6d   : > { %v292_v40 = vadd.f32 %v290_v37, %v288_v35  ;;  %455 = vst [vmem:[%s1425_s5 + $0x20] sm:$0xff] %v321_v49  ;;  %v377_v3 = vld [vmem:[%s1405_s4 + $0x58] sm:$0xff]  ;;  %v385_v5 = vld [vmem:[%s1405_s4 + $0x60] sm:$0xff]  ;;  %v393_v8 = vld [vmem:[%s1405_s4 + $0x68] sm:$0xff] }
  0x6e   : > { %v299_v42 = vadd.f32 %v297_v38, %v291_v36  ;;  %456 = vst [vmem:[%s1425_s5 + $0x28] sm:$0xff] %v329_v52  ;;  %v354_v7 = vld [vmem:[%s1405_s4 + $0xc0] sm:$0xff]  ;;  %v401_v10 = vld [vmem:[%s1405_s4 + $0x70] sm:$0xff]  ;;  %v362_v12 = vld [vmem:[%s1405_s4 + $0xc8] sm:$0xff] }
  0x6f   : > { %v300_v44 = vadd.f32 %v298_v39, %v292_v40  ;;  %457 = vst [vmem:[%s1425_s5 + $0x30] sm:$0xff] %v337_v54  ;;  %v409_v13 = vld [vmem:[%s1405_s4 + $0x78] sm:$0xff]  ;;  %v370_v16 = vld [vmem:[%s1405_s4 + $0xd0] sm:$0xff]  ;;  %v386_v22 = vld [vmem:[%s1405_s4 + $0xe0] sm:$0xff] }
  0x70   : > { %v307_v46 = vadd.f32 %v305_v41, %v299_v42  ;;  %458 = vst [vmem:[%s1425_s5 + $0x38] sm:$0xff] %v345_v57  ;;  %v378_v19 = vld [vmem:[%s1405_s4 + $0xd8] sm:$0xff]  ;;  %v394_v25 = vld [vmem:[%s1405_s4 + $0xe8] sm:$0xff]  ;;  %v402_v28 = vld [vmem:[%s1405_s4 + $0xf0] sm:$0xff] }
  0x71   : > { %v308_v48 = vadd.f32 %v306_v43, %v300_v44  ;;  %459 = vst [vmem:[%s1425_s5 + $0x40] sm:$0xff] %v353_v59  ;;  %v410_v31 = vld [vmem:[%s1405_s4 + $0xf8] sm:$0xff] }
  0x72   : > { %v315_v50 = vadd.f32 %v313_v45, %v307_v46  ;;  %460 = vst [vmem:[%s1425_s5 + $0x48] sm:$0xff] %v361_v62 }
  0x73   : > { %v316_v53 = vadd.f32 %v314_v47, %v308_v48  ;;  %461 = vst [vmem:[%s1425_s5 + $0x50] sm:$0xff] %v369_v0 }
  0x74   : > { %v323_v55 = vadd.f32 %v321_v49, %v315_v50  ;;  %462 = vst [vmem:[%s1425_s5 + $0x58] sm:$0xff] %v377_v3 }
  0x75   : > { %v324_v58 = vadd.f32 %v322_v51, %v316_v53  ;;  %463 = vst [vmem:[%s1425_s5 + $0x60] sm:$0xff] %v385_v5 }
  0x76   : > { %v331_v60 = vadd.f32 %v329_v52, %v323_v55  ;;  %464 = vst [vmem:[%s1425_s5 + $0x68] sm:$0xff] %v393_v8 }
  0x77   : > { %v332_v63 = vadd.f32 %v330_v56, %v324_v58  ;;  %465 = vst [vmem:[%s1425_s5 + $0x70] sm:$0xff] %v401_v10 }
  0x78   : > { %v339_v1 = vadd.f32 %v337_v54, %v331_v60  ;;  %466 = vst [vmem:[%s1425_s5 + $0x78] sm:$0xff] %v409_v13 }
  0x79   : > { %v340_v4 = vadd.f32 %v338_v61, %v332_v63  ;;  %467 = vst [vmem:[%s1425_s5 + $0x100] sm:$0xff] %v290_v37 }
  0x7a   : > { %v347_v6 = vadd.f32 %v345_v57, %v339_v1  ;;  %468 = vst [vmem:[%s1425_s5 + $0x108] sm:$0xff] %v298_v39 }
  0x7b   : > { %v348_v9 = vadd.f32 %v346_v2, %v340_v4  ;;  %469 = vst [vmem:[%s1425_s5 + $0x110] sm:$0xff] %v306_v43 }
  0x7c   : > { %v355_v11 = vadd.f32 %v353_v59, %v347_v6  ;;  %470 = vst [vmem:[%s1425_s5 + $0x118] sm:$0xff] %v314_v47 }
  0x7d   : > { %v356_v14 = vadd.f32 %v354_v7, %v348_v9  ;;  %471 = vst [vmem:[%s1425_s5 + $0x120] sm:$0xff] %v322_v51 }
  0x7e   : > { %v363_v15 = vadd.f32 %v361_v62, %v355_v11  ;;  %472 = vst [vmem:[%s1425_s5 + $0x128] sm:$0xff] %v330_v56 }
  0x7f   : > { %v364_v17 = vadd.f32 %v362_v12, %v356_v14  ;;  %473 = vst [vmem:[%s1425_s5 + $0x130] sm:$0xff] %v338_v61 }
  0x80   : > { %v371_v18 = vadd.f32 %v369_v0, %v363_v15  ;;  %474 = vst [vmem:[%s1425_s5 + $0x138] sm:$0xff] %v346_v2 }
  0x81   : > { %v372_v20 = vadd.f32 %v370_v16, %v364_v17  ;;  %475 = vst [vmem:[%s1425_s5 + $0x140] sm:$0xff] %v354_v7 }
  0x82   : > { %v379_v21 = vadd.f32 %v377_v3, %v371_v18  ;;  %476 = vst [vmem:[%s1425_s5 + $0x148] sm:$0xff] %v362_v12 }
  0x83   : > { %v380_v23 = vadd.f32 %v378_v19, %v372_v20  ;;  %477 = vst [vmem:[%s1425_s5 + $0x150] sm:$0xff] %v370_v16 }
  0x84   : > { %v387_v24 = vadd.f32 %v385_v5, %v379_v21  ;;  %478 = vst [vmem:[%s1425_s5 + $0x158] sm:$0xff] %v378_v19 }
  0x85   : > { %v388_v26 = vadd.f32 %v386_v22, %v380_v23  ;;  %479 = vst [vmem:[%s1425_s5 + $0x160] sm:$0xff] %v386_v22 }
  0x86   : > { %v395_v27 = vadd.f32 %v393_v8, %v387_v24  ;;  %480 = vst [vmem:[%s1425_s5 + $0x168] sm:$0xff] %v394_v25 }
  0x87   : > { %v396_v29 = vadd.f32 %v394_v25, %v388_v26  ;;  %481 = vst [vmem:[%s1425_s5 + $0x170] sm:$0xff] %v402_v28 }
  0x88   : > { %v403_v30 = vadd.f32 %v401_v10, %v395_v27  ;;  %482 = vst [vmem:[%s1425_s5 + $0x178] sm:$0xff] %v410_v31 }
  0x89   : > { %v404_v32 = vadd.f32 %v402_v28, %v396_v29  ;;  %486 = sbr.rel (%p951_p6) target bundleno = 317 (0x13d), region = 67 }
  0x8a   : > { %v411_v33 = vadd.f32 %v409_v13, %v403_v30 }
  0x8b   : > { %v412_v34 = vadd.f32 %v410_v31, %v404_v32 }
  0x8c   : > { %413 = vst [vmem:[#allocation2] sm:$0xff] %v411_v33 }
  0x8d   : > { %414 = vst [vmem:[#allocation2 + $0x8] sm:$0xff] %v412_v34 }
  0x8e   : > { %v495_v37 = vlaneseq  ;;  %v541_v44 = vstv %s1486_s20  ;;  %v514_v45 = vstv %s1488_s8  ;;  %v535_v46 = vstv %s1490_s24 }
  0x8f   : > { %v562_v48 = vstv %s1492_s25  ;;  %v583_v12 = vstv %s1498_s26  ;;  %vm626_vm11 = vcmask 7168  }
  0x90   : > { %v496_v39 = vshrl.u32 %v495_v37, 7 }
  0x92   : > { %v497_v40 = vadd.s32 8, %v496_v39  ;;  %v503_v42 = vadd.s32 4294967294, %v496_v39  ;;  %v524_v43 = vadd.s32 4294967295, %v496_v39  ;;  %vm500_vm0 = vcmp.lt.s32.totalorder %v496_v39, 2 }
  0x93   : > { %v487_v35 = vld [vmem:[#allocation2] sm:$0xff]  ;;  %vm521_vm1 = vcmp.lt.s32.totalorder %v496_v39, 1  ;;  %vm548_vm2 = vcmp.lt.s32.totalorder %v496_v39, 7  ;;  %vm569_vm5 = vcmp.lt.s32.totalorder %v496_v39, 6 }
  0x94   : > { %489 = vadd.xlane.f32.xlu0 %v487_v35  ;;  %v488_v36 = vld [vmem:[#allocation2 + $0x8] sm:$0xff]  ;;  %v552_v47 = vadd.s32 1, %v497_v40  ;;  %v573_v49 = vadd.s32 2, %v497_v40  ;;  %vm505_vm3 = vcmp.ge.s32.totalorder %v503_v42, 0  ;;  %vm526_vm4 = vcmp.ge.s32.totalorder %v524_v43, 0 }
  0x96   : > { %vm556_vm6 = vcmp.lt.s32.totalorder %v552_v47, 16  ;;  %vm577_vm7 = vcmp.lt.s32.totalorder %v573_v49, 16 }
  0x9c   : > { %491 = vadd.xlane.f32.xlu0 %v488_v36 }
 0x107   : > { %v490_v38 = vpop.xlane.xlu0 %489 }
 0x108   : > { %v493_v41 = vmul.f32 0.00024414063, %v490_v38 }
 0x10a   : > { %v498_v52 = vrot.slane %v493_v41, 6  ;;  %v519_v53 = vrot.slane %v493_v41, 7  ;;  %v546_v57 = vrot.slane %v493_v41, 1  ;;  %v567_v3 = vrot.slane %v493_v41, 2 }
 0x10b   : > { %v542_v11 = vmul.f32 %v541_v44, %v493_v41 }
 0x10f   : > { %v492_v50 = vpop.xlane.xlu0 %491 }
 0x110   : > { %v494_v51 = vmul.f32 0.00024414063, %v492_v50 }
 0x112   : > { %v499_v54 = vrot.slane %v494_v51, 6  ;;  %v520_v55 = vrot.slane %v494_v51, 7  ;;  %v547_v56 = vrot.slane %v494_v51, 1  ;;  %v568_v58 = vrot.slane %v494_v51, 2 }
 0x113   : > { %v543_v8 = vmul.f32 %v541_v44, %v494_v51 }
 0x114   : > { %v501_v59 = vsel %vm500_vm0, %v498_v52, %v499_v54  ;;  %v502_v60 = vsel %vm500_vm0, %v499_v54, %v498_v52  ;;  %v522_v61 = vsel %vm521_vm1, %v519_v53, %v520_v55  ;;  %v523_v62 = vsel %vm521_vm1, %v520_v55, %v519_v53 }
 0x115   : > { %v511_v63 = vsel %vm505_vm3, %v502_v60, 0.0  ;;  %v516_v0 = vmul.f32 %v514_v45, %v501_v59  ;;  %v532_v1 = vsel %vm526_vm4, %v523_v62, 0.0  ;;  %v537_v2 = vmul.f32 %v535_v46, %v522_v61 }
 0x116   : > { %v515_v4 = vmul.f32 %v514_v45, %v511_v63  ;;  %v536_v5 = vmul.f32 %v535_v46, %v532_v1  ;;  %v550_v6 = vsel %vm548_vm2, %v547_v56, %v546_v57  ;;  %v549_v9 = vsel %vm548_vm2, %v546_v57, %v547_v56 }
 0x117   : > { %v539_v7 = vadd.f32 %v537_v2, %v516_v0  ;;  %v560_v10 = vsel %vm556_vm6, %v550_v6, 0.0  ;;  %v571_v14 = vsel %vm569_vm5, %v568_v58, %v567_v3  ;;  %v570_v17 = vsel %vm569_vm5, %v567_v3, %v568_v58 }
 0x118   : > { %v538_v13 = vadd.f32 %v536_v5, %v515_v4  ;;  %v564_v16 = vmul.f32 %v562_v48, %v560_v10  ;;  %v581_v18 = vsel %vm577_vm7, %v571_v14, 0.0  ;;  %v563_v20 = vmul.f32 %v562_v48, %v549_v9 }
 0x119   : > { %v545_v15 = vadd.f32 %v543_v8, %v539_v7  ;;  %v585_v22 = vmul.f32 %v583_v12, %v581_v18  ;;  %v584_v24 = vmul.f32 %v583_v12, %v570_v17 }
 0x11a   : > { %v544_v19 = vadd.f32 %v542_v11, %v538_v13 }
 0x11b   : > { %v566_v21 = vadd.f32 %v564_v16, %v545_v15 }
 0x11c   : > { %v565_v23 = vadd.f32 %v563_v20, %v544_v19 }
 0x11d   : > { %v587_v25 = vadd.f32 %v585_v22, %v566_v21 }
 0x11e   : > { %v586_v26 = vadd.f32 %v584_v24, %v565_v23 }
 0x11f   : > { %v957_v27 = vmul.f32 -1.442695, %v587_v25 }
 0x120   : > { %v956_v28 = vmul.f32 -1.442695, %v586_v26 }
 0x121   : > { %1067 = vpow2.f32 %v957_v27 }
 0x122   : > { %1069 = vpow2.f32 %v956_v28 }
 0x127   : > { %v1068_v29 = vpop.eup %1067 }
 0x128   : > { %v1070_v30 = vpop.eup %1069  ;;  %v595_v31 = vadd.f32 1.0, %v1068_v29 }
 0x129   : > { %v594_v32 = vadd.f32 1.0, %v1070_v30 }
 0x12a   : > { %1071 = vrcp.f32 %v595_v31  ;;  %v622_v39 = vand.u32 2147483648, %v595_v31  ;;  %v620_v42 = vand.u32 2147483647, %v595_v31  ;;  %vm616_vm10 = vweird.f32 %v595_v31 }
 0x12b   : > { %1073 = vrcp.f32 %v594_v32  ;;  %v607_v40 = vand.u32 2147483648, %v594_v32  ;;  %v605_v44 = vand.u32 2147483647, %v594_v32  ;;  %vm601_vm12 = vweird.f32 %v594_v32 }
 0x12c   : > { %v623_v47 = vor.u32 1.1754944e-38, %v622_v39  ;;  %vm621_vm15 = vcmp.eq.f32.partialorder %v620_v42, 8.507059e+37 }
 0x12d   : > { %v608_v48 = vor.u32 1.1754944e-38, %v607_v40  ;;  %vm606_vm0 = vcmp.eq.f32.partialorder %v605_v44, 8.507059e+37 }
 0x130   : > { %v1072_v33 = vpop.eup %1071 }
 0x131   : > { %v1074_v34 = vpop.eup %1073  ;;  %v612_v35 = vmul.f32 %v1072_v33, %v595_v31  ;;  %vm617_vm8 = vweird.f32 %v1072_v33 }
 0x132   : > { %v597_v36 = vmul.f32 %v1074_v34, %v594_v32  ;;  %vm602_vm9 = vweird.f32 %v1074_v34  ;;  %vm618_vm13 = vmor %vm616_vm10, %vm617_vm8 }
 0x133   : > { %v613_v37 = vsub.f32 1.0, %v612_v35  ;;  %vm603_vm14 = vmor %vm601_vm12, %vm602_vm9 }
 0x134   : > { %v598_v38 = vsub.f32 1.0, %v597_v36 }
 0x135   : > { %v614_v41 = vmul.f32 %v1072_v33, %v613_v37 }
 0x136   : > { %v599_v43 = vmul.f32 %v1074_v34, %v598_v38 }
 0x137   : > { %v615_v45 = vadd.f32 %v1072_v33, %v614_v41 }
 0x138   : > { %v600_v46 = vadd.f32 %v1074_v34, %v599_v43 }
 0x139   : > { %v619_v49 = vsel %vm618_vm13, %v1072_v33, %v615_v45 }
 0x13a   : > { %v604_v50 = vsel %vm603_vm14, %v1074_v34, %v600_v46  ;;  %v624_v51 = vsel %vm621_vm15, %v623_v47, %v619_v49 }
 0x13b   : > { %v609_v52 = vsel %vm606_vm0, %v608_v48, %v604_v50  ;;  %628 = vst.msk [vmem:[#allocation3 + $0x8] sm:$0xff] %vm626_vm11, %v624_v51 }
 0x13c   : > { %627 = vst.msk [vmem:[#allocation3] sm:$0xff] %vm626_vm11, %v609_v52 }
 0x13d PF: > { %p958_p7 = scmp.ne.s32.totalorder %s1161_s14, 1 }
 0x13e   : > { %s633_s3 = sshra.s32 (!%p958_p7), %s947_s23, 7 }
 0x13f   : > { %632 = sbr.rel (%p958_p7) target bundleno = 475 (0x1db), region = 71  ;;  %s959_s27 = sshll.u32 (!%p958_p7), %s633_s3, 3 }
 0x140   : > { %s1515_s29 = scalar_lea.vmem (!%p958_p7), [#allocation4], %s959_s27 }
 0x144   : > { %v669_v53 = vld [vmem:[#allocation3] sm:$0xff]  ;;  %v1185_v54 = vmov 0   ;;  %v670_v55 = vld [vmem:[#allocation3 + $0x8] sm:$0xff]  ;;  %v637_v56 = vld [vmem:[%s1515_s29] sm:$0xff] }
 0x145   : > { %1075 = vset.pattern.permute.xlu0 %v1185_v54  ;;  %v638_v57 = vld [vmem:[%s1515_s29 + $0x8] sm:$0xff]  ;;  %v639_v58 = vld [vmem:[%s1515_s29 + $0x10] sm:$0xff]  ;;  %v640_v59 = vld [vmem:[%s1515_s29 + $0x18] sm:$0xff] }
 0x146   : > { %673 = vperm.xlu0 %1075, %v669_v53   ;;  %v641_v61 = vld [vmem:[%s1515_s29 + $0x20] sm:$0xff]  ;;  %v642_v62 = vld [vmem:[%s1515_s29 + $0x28] sm:$0xff]  ;;  %v643_v2 = vld [vmem:[%s1515_s29 + $0x30] sm:$0xff] }
 0x147   : > { %v644_v4 = vld [vmem:[%s1515_s29 + $0x38] sm:$0xff]  ;;  %v645_v6 = vld [vmem:[%s1515_s29 + $0x40] sm:$0xff]  ;;  %v646_v8 = vld [vmem:[%s1515_s29 + $0x48] sm:$0xff] }
 0x148   : > { %v647_v10 = vld [vmem:[%s1515_s29 + $0x50] sm:$0xff]  ;;  %v648_v12 = vld [vmem:[%s1515_s29 + $0x58] sm:$0xff]  ;;  %v649_v14 = vld [vmem:[%s1515_s29 + $0x60] sm:$0xff] }
 0x149   : > { %v650_v16 = vld [vmem:[%s1515_s29 + $0x68] sm:$0xff]  ;;  %v651_v18 = vld [vmem:[%s1515_s29 + $0x70] sm:$0xff]  ;;  %v652_v20 = vld [vmem:[%s1515_s29 + $0x78] sm:$0xff] }
 0x14a   : > { %v653_v24 = vld [vmem:[%s1515_s29 + $0x100] sm:$0xff]  ;;  %v654_v26 = vld [vmem:[%s1515_s29 + $0x108] sm:$0xff]  ;;  %v655_v28 = vld [vmem:[%s1515_s29 + $0x110] sm:$0xff] }
 0x14b   : > { %v656_v29 = vld [vmem:[%s1515_s29 + $0x118] sm:$0xff]  ;;  %v657_v31 = vld [vmem:[%s1515_s29 + $0x120] sm:$0xff]  ;;  %v658_v33 = vld [vmem:[%s1515_s29 + $0x128] sm:$0xff] }
 0x14c   : > { %v659_v35 = vld [vmem:[%s1515_s29 + $0x130] sm:$0xff]  ;;  %v660_v37 = vld [vmem:[%s1515_s29 + $0x138] sm:$0xff]  ;;  %v661_v39 = vld [vmem:[%s1515_s29 + $0x140] sm:$0xff] }
 0x14d   : > { %v662_v41 = vld [vmem:[%s1515_s29 + $0x148] sm:$0xff]  ;;  %v663_v43 = vld [vmem:[%s1515_s29 + $0x150] sm:$0xff]  ;;  %v664_v45 = vld [vmem:[%s1515_s29 + $0x158] sm:$0xff] }
 0x14e   : > { %678 = vperm.xlu0 %1075, %v670_v55   ;;  %v665_v47 = vld [vmem:[%s1515_s29 + $0x160] sm:$0xff]  ;;  %v666_v49 = vld [vmem:[%s1515_s29 + $0x168] sm:$0xff]  ;;  %v667_v51 = vld [vmem:[%s1515_s29 + $0x170] sm:$0xff] }
 0x14f   : > { %v668_v53 = vld [vmem:[%s1515_s29 + $0x178] sm:$0xff] }
 0x1b8   : > { %v674_v60 = vpop.permute.xlu0 %673 }
 0x1b9   : > { %v681_v63 = vmul.f32 %v674_v60, %v637_v56  ;;  %v682_v0 = vmul.f32 %v674_v60, %v638_v57  ;;  %v683_v1 = vmul.f32 %v674_v60, %v639_v58  ;;  %v684_v3 = vmul.f32 %v674_v60, %v640_v59 }
 0x1ba   : > { %v685_v5 = vmul.f32 %v674_v60, %v641_v61  ;;  %v686_v7 = vmul.f32 %v674_v60, %v642_v62  ;;  %v687_v9 = vmul.f32 %v674_v60, %v643_v2  ;;  %v688_v11 = vmul.f32 %v674_v60, %v644_v4 }
 0x1bb   : > { %713 = vst [vmem:[%s1413_s7] sm:$0xff] %v681_v63  ;;  %v689_v13 = vmul.f32 %v674_v60, %v645_v6  ;;  %v690_v15 = vmul.f32 %v674_v60, %v646_v8  ;;  %v691_v17 = vmul.f32 %v674_v60, %v647_v10  ;;  %v692_v19 = vmul.f32 %v674_v60, %v648_v12 }
 0x1bc   : > { %714 = vst [vmem:[%s1413_s7 + $0x8] sm:$0xff] %v682_v0  ;;  %v693_v21 = vmul.f32 %v674_v60, %v649_v14  ;;  %v694_v22 = vmul.f32 %v674_v60, %v650_v16  ;;  %v695_v25 = vmul.f32 %v674_v60, %v651_v18  ;;  %v696_v27 = vmul.f32 %v674_v60, %v652_v20 }
 0x1bd   : > { %715 = vst [vmem:[%s1413_s7 + $0x10] sm:$0xff] %v683_v1 }
 0x1be   : > { %716 = vst [vmem:[%s1413_s7 + $0x18] sm:$0xff] %v684_v3 }
 0x1bf   : > { %717 = vst [vmem:[%s1413_s7 + $0x20] sm:$0xff] %v685_v5 }
 0x1c0   : > { %718 = vst [vmem:[%s1413_s7 + $0x28] sm:$0xff] %v686_v7  ;;  %v679_v23 = vpop.permute.xlu0 %678 }
 0x1c1   : > { %719 = vst [vmem:[%s1413_s7 + $0x30] sm:$0xff] %v687_v9  ;;  %v697_v30 = vmul.f32 %v679_v23, %v653_v24  ;;  %v698_v32 = vmul.f32 %v679_v23, %v654_v26  ;;  %v699_v34 = vmul.f32 %v679_v23, %v655_v28  ;;  %v700_v36 = vmul.f32 %v679_v23, %v656_v29 }
 0x1c2   : > { %720 = vst [vmem:[%s1413_s7 + $0x38] sm:$0xff] %v688_v11  ;;  %v701_v38 = vmul.f32 %v679_v23, %v657_v31  ;;  %v702_v40 = vmul.f32 %v679_v23, %v658_v33  ;;  %v703_v42 = vmul.f32 %v679_v23, %v659_v35  ;;  %v704_v44 = vmul.f32 %v679_v23, %v660_v37 }
 0x1c3   : > { %721 = vst [vmem:[%s1413_s7 + $0x40] sm:$0xff] %v689_v13  ;;  %v705_v46 = vmul.f32 %v679_v23, %v661_v39  ;;  %v706_v48 = vmul.f32 %v679_v23, %v662_v41  ;;  %v707_v50 = vmul.f32 %v679_v23, %v663_v43  ;;  %v708_v52 = vmul.f32 %v679_v23, %v664_v45 }
 0x1c4   : > { %722 = vst [vmem:[%s1413_s7 + $0x48] sm:$0xff] %v690_v15  ;;  %v709_v54 = vmul.f32 %v679_v23, %v665_v47  ;;  %v710_v55 = vmul.f32 %v679_v23, %v666_v49  ;;  %v711_v56 = vmul.f32 %v679_v23, %v667_v51  ;;  %v712_v57 = vmul.f32 %v679_v23, %v668_v53 }
 0x1c5   : > { %723 = vst [vmem:[%s1413_s7 + $0x50] sm:$0xff] %v691_v17 }
 0x1c6   : > { %724 = vst [vmem:[%s1413_s7 + $0x58] sm:$0xff] %v692_v19 }
 0x1c7   : > { %725 = vst [vmem:[%s1413_s7 + $0x60] sm:$0xff] %v693_v21 }
 0x1c8   : > { %726 = vst [vmem:[%s1413_s7 + $0x68] sm:$0xff] %v694_v22 }
 0x1c9   : > { %727 = vst [vmem:[%s1413_s7 + $0x70] sm:$0xff] %v695_v25 }
 0x1ca   : > { %728 = vst [vmem:[%s1413_s7 + $0x78] sm:$0xff] %v696_v27 }
 0x1cb   : > { %729 = vst [vmem:[%s1413_s7 + $0x80] sm:$0xff] %v697_v30 }
 0x1cc   : > { %730 = vst [vmem:[%s1413_s7 + $0x88] sm:$0xff] %v698_v32 }
 0x1cd   : > { %731 = vst [vmem:[%s1413_s7 + $0x90] sm:$0xff] %v699_v34 }
 0x1ce   : > { %732 = vst [vmem:[%s1413_s7 + $0x98] sm:$0xff] %v700_v36 }
 0x1cf   : > { %733 = vst [vmem:[%s1413_s7 + $0xa0] sm:$0xff] %v701_v38 }
 0x1d0   : > { %734 = vst [vmem:[%s1413_s7 + $0xa8] sm:$0xff] %v702_v40 }
 0x1d1   : > { %735 = vst [vmem:[%s1413_s7 + $0xb0] sm:$0xff] %v703_v42 }
 0x1d2   : > { %736 = vst [vmem:[%s1413_s7 + $0xb8] sm:$0xff] %v704_v44 }
 0x1d3   : > { %737 = vst [vmem:[%s1413_s7 + $0xc0] sm:$0xff] %v705_v46 }
 0x1d4   : > { %738 = vst [vmem:[%s1413_s7 + $0xc8] sm:$0xff] %v706_v48 }
 0x1d5   : > { %739 = vst [vmem:[%s1413_s7 + $0xd0] sm:$0xff] %v707_v50 }
 0x1d6   : > { %740 = vst [vmem:[%s1413_s7 + $0xd8] sm:$0xff] %v708_v52 }
 0x1d7   : > { %741 = vst [vmem:[%s1413_s7 + $0xe0] sm:$0xff] %v709_v54 }
 0x1d8   : > { %742 = vst [vmem:[%s1413_s7 + $0xe8] sm:$0xff] %v710_v55 }
 0x1d9   : > { %743 = vst [vmem:[%s1413_s7 + $0xf0] sm:$0xff] %v711_v56 }
 0x1da   : > { %744 = vst [vmem:[%s1413_s7 + $0xf8] sm:$0xff] %v712_v57 }
 0x1db PF: > { %751 = sbr.rel (!%p1304_p12) target bundleno = 514 (0x202), region = 75  ;;  %s962_s4 = sshll.u32 (%p1304_p12), %s1165_s15, 6  ;;  %v770_v58 = vld [vmem:[%s1413_s7] sm:$0xff] (%p1304_p12)  ;;  %v772_v59 = vld [vmem:[%s1413_s7 + $0x8] sm:$0xff] (%p1304_p12)  ;;  %v774_v60 = vld [vmem:[%s1413_s7 + $0x10] sm:$0xff] (%p1304_p12) }
 0x1dc   : > { %s752_s16 = smul.u32 (%p1304_p12), %s1157_s13, %s1161_s14  ;;  %v776_v61 = vld [vmem:[%s1413_s7 + $0x18] sm:$0xff] (%p1304_p12)  ;;  %v778_v62 = vld [vmem:[%s1413_s7 + $0x20] sm:$0xff] (%p1304_p12)  ;;  %v780_v63 = vld [vmem:[%s1413_s7 + $0x28] sm:$0xff] (%p1304_p12) }
 0x1dd   : > { %v782_v0 = vld [vmem:[%s1413_s7 + $0x30] sm:$0xff] (%p1304_p12)  ;;  %v784_v1 = vld [vmem:[%s1413_s7 + $0x38] sm:$0xff] (%p1304_p12)  ;;  %v786_v2 = vld [vmem:[%s1413_s7 + $0x40] sm:$0xff] (%p1304_p12) }
 0x1de   : > { %s961_s1 = sshll.u32 (%p1304_p12), %s752_s16, 4  ;;  %v788_v3 = vld [vmem:[%s1413_s7 + $0x48] sm:$0xff] (%p1304_p12)  ;;  %v790_v4 = vld [vmem:[%s1413_s7 + $0x50] sm:$0xff] (%p1304_p12)  ;;  %v792_v5 = vld [vmem:[%s1413_s7 + $0x58] sm:$0xff] (%p1304_p12) }
 0x1df   : > { %s755_s23 = sadd.s32 (%p1304_p12), %s962_s4, %s961_s1  ;;  %v794_v6 = vld [vmem:[%s1413_s7 + $0x60] sm:$0xff] (%p1304_p12)  ;;  %v796_v7 = vld [vmem:[%s1413_s7 + $0x68] sm:$0xff] (%p1304_p12)  ;;  %v798_v8 = vld [vmem:[%s1413_s7 + $0x70] sm:$0xff] (%p1304_p12) }
 0x1e0   : > { %s963_s6 = sshll.u32 %s755_s23, 3  ;;  %v800_v9 = vld [vmem:[%s1413_s7 + $0x78] sm:$0xff]  ;;  %v802_v10 = vld [vmem:[%s1413_s7 + $0x80] sm:$0xff]  ;;  %v804_v11 = vld [vmem:[%s1413_s7 + $0x88] sm:$0xff] }
 0x1e1   : > { %s1591_s11 = scalar_lea.vmem %s1690_s2, %s963_s6  ;;  %v806_v12 = vld [vmem:[%s1413_s7 + $0x90] sm:$0xff]  ;;  %v808_v13 = vld [vmem:[%s1413_s7 + $0x98] sm:$0xff]  ;;  %v810_v14 = vld [vmem:[%s1413_s7 + $0xa0] sm:$0xff] }
 0x1e2   : > { %771 = vst [vmem:[%s1591_s11] sm:$0xff] %v770_v58  ;;  %v812_v15 = vld [vmem:[%s1413_s7 + $0xa8] sm:$0xff]  ;;  %v814_v16 = vld [vmem:[%s1413_s7 + $0xb0] sm:$0xff]  ;;  %v816_v17 = vld [vmem:[%s1413_s7 + $0xb8] sm:$0xff] }
 0x1e3   : > { %773 = vst [vmem:[%s1591_s11 + $0x8] sm:$0xff] %v772_v59  ;;  %v818_v18 = vld [vmem:[%s1413_s7 + $0xc0] sm:$0xff]  ;;  %v820_v19 = vld [vmem:[%s1413_s7 + $0xc8] sm:$0xff]  ;;  %v822_v20 = vld [vmem:[%s1413_s7 + $0xd0] sm:$0xff] }
 0x1e4   : > { %775 = vst [vmem:[%s1591_s11 + $0x10] sm:$0xff] %v774_v60  ;;  %v824_v21 = vld [vmem:[%s1413_s7 + $0xd8] sm:$0xff]  ;;  %v826_v22 = vld [vmem:[%s1413_s7 + $0xe0] sm:$0xff]  ;;  %v828_v23 = vld [vmem:[%s1413_s7 + $0xe8] sm:$0xff] }
 0x1e5   : > { %777 = vst [vmem:[%s1591_s11 + $0x18] sm:$0xff] %v776_v61  ;;  %v830_v24 = vld [vmem:[%s1413_s7 + $0xf0] sm:$0xff]  ;;  %v832_v25 = vld [vmem:[%s1413_s7 + $0xf8] sm:$0xff] }
 0x1e6   : > { %779 = vst [vmem:[%s1591_s11 + $0x20] sm:$0xff] %v778_v62 }
 0x1e7   : > { %781 = vst [vmem:[%s1591_s11 + $0x28] sm:$0xff] %v780_v63 }
 0x1e8   : > { %783 = vst [vmem:[%s1591_s11 + $0x30] sm:$0xff] %v782_v0 }
 0x1e9   : > { %785 = vst [vmem:[%s1591_s11 + $0x38] sm:$0xff] %v784_v1 }
 0x1ea   : > { %787 = vst [vmem:[%s1591_s11 + $0x40] sm:$0xff] %v786_v2 }
 0x1eb   : > { %789 = vst [vmem:[%s1591_s11 + $0x48] sm:$0xff] %v788_v3 }
 0x1ec   : > { %791 = vst [vmem:[%s1591_s11 + $0x50] sm:$0xff] %v790_v4 }
 0x1ed   : > { %793 = vst [vmem:[%s1591_s11 + $0x58] sm:$0xff] %v792_v5 }
 0x1ee   : > { %795 = vst [vmem:[%s1591_s11 + $0x60] sm:$0xff] %v794_v6 }
 0x1ef   : > { %797 = vst [vmem:[%s1591_s11 + $0x68] sm:$0xff] %v796_v7 }
 0x1f0   : > { %799 = vst [vmem:[%s1591_s11 + $0x70] sm:$0xff] %v798_v8 }
 0x1f1   : > { %801 = vst [vmem:[%s1591_s11 + $0x78] sm:$0xff] %v800_v9 }
 0x1f2   : > { %803 = vst [vmem:[%s1591_s11 + $0x100] sm:$0xff] %v802_v10 }
 0x1f3   : > { %805 = vst [vmem:[%s1591_s11 + $0x108] sm:$0xff] %v804_v11 }
 0x1f4   : > { %807 = vst [vmem:[%s1591_s11 + $0x110] sm:$0xff] %v806_v12 }
 0x1f5   : > { %809 = vst [vmem:[%s1591_s11 + $0x118] sm:$0xff] %v808_v13 }
 0x1f6   : > { %811 = vst [vmem:[%s1591_s11 + $0x120] sm:$0xff] %v810_v14 }
 0x1f7   : > { %813 = vst [vmem:[%s1591_s11 + $0x128] sm:$0xff] %v812_v15 }
 0x1f8   : > { %815 = vst [vmem:[%s1591_s11 + $0x130] sm:$0xff] %v814_v16 }
 0x1f9   : > { %817 = vst [vmem:[%s1591_s11 + $0x138] sm:$0xff] %v816_v17 }
 0x1fa   : > { %819 = vst [vmem:[%s1591_s11 + $0x140] sm:$0xff] %v818_v18 }
 0x1fb   : > { %821 = vst [vmem:[%s1591_s11 + $0x148] sm:$0xff] %v820_v19 }
 0x1fc   : > { %823 = vst [vmem:[%s1591_s11 + $0x150] sm:$0xff] %v822_v20 }
 0x1fd   : > { %825 = vst [vmem:[%s1591_s11 + $0x158] sm:$0xff] %v824_v21 }
 0x1fe   : > { %827 = vst [vmem:[%s1591_s11 + $0x160] sm:$0xff] %v826_v22 }
 0x1ff   : > { %829 = vst [vmem:[%s1591_s11 + $0x168] sm:$0xff] %v828_v23 }
 0x200   : > { %831 = vst [vmem:[%s1591_s11 + $0x170] sm:$0xff] %v830_v24 }
 0x201   : > { %833 = vst [vmem:[%s1591_s11 + $0x178] sm:$0xff] %v832_v25 }
 0x202 PF: > { %s13_s19 = sadd.s32 1, %s1181_s19   ;;  %s1705_s13 = sld [smem:[#allocation10_spill]] }
 0x203   : > { %p10_p8 = scmp.ge.s32.totalorder %s13_s19, 10   ;;  %s1706_s14 = sld [smem:[#allocation11_spill]] }
 0x204   : > { %s1707_s5 = sld [smem:[#allocation12_spill]]  ;;  %s1708_s9 = smov %s1145_s10 }
 0x205   : > { %s1709_s10 = smov %s1298_s17  ;;  %s1710_s11 = smov %s1153_s12 }
 0x206   : > { %s1711_s12 = smov %s1295_s28  ;;  %s1712_s15 = smov %s1177_s18 }
 0x207   : > { %s1713_s16 = smov %s1717_s21  ;;  %s1714_s17 = smov %s1721_s22 }
 0x208   :  { %12 = sbr.rel (!%p10_p8) target bundleno = 8 (0x8), region = 132 }
 0x20a   : > { %s1715_s18 = smov %s1707_s5 }
 0x20d   :  { %849 = vsyncpa [#allocation7], 1 }
 0x20e   :  { %851 = vsyncpa [#allocation7 + $0x1], 1 }

</bundles_post_ra>
